<compile_context>
chip_gen: v7x
topology: tpu7x:2x2x1
jax: 0.10.0
libtpu: 0.0.40
codegen_flags: <defaults>
</compile_context>

<pallas_src>
import functools

import jax
import jax.numpy as jnp
from jax.experimental import pallas as pl
from jax.experimental.pallas import tpu as pltpu
import numpy as np


def sbert_head_kernel(bert_ref, subj_ref, obj_ref, wp_ref, bp_ref,
                      wbl2_ref, bbl_ref, out_ref, *, pool_dtype):
    # bert_ref: (TB, S, E) bf16        subj_ref / obj_ref: (TB, S) f32
    # wp_ref:  (E, H)   bf16           bp_ref:  (1, H) f32
    # wbl2_ref:(H, R*H) bf16 (wbl2[i, r*H + j] = Wbl[r, i, j])
    # bbl_ref: (1, R)   f32            out_ref: (TB, R) f32
    cdt = wp_ref.dtype                                   # bf16 MXU dtype
    TB = out_ref.shape[0]
    H = wp_ref.shape[-1]
    R = bbl_ref.shape[-1]

    # --- Pool first (weighted sum over S), project after. -------------------
    # map @ (X Wp + 1 bp) == (map @ X) Wp + sum(map) * bp   (exact reorder)
    bert = bert_ref[...].astype(pool_dtype)              # single read/cast of big tile
    subj = subj_ref[...]                                 # (TB, S) f32
    obj = obj_ref[...]                                   # (TB, S) f32

    subj_b = subj.astype(pool_dtype)[:, :, None]         # (TB, S, 1) lane-broadcast
    obj_b = obj.astype(pool_dtype)[:, :, None]
    vs_raw = jnp.sum(bert * subj_b, axis=1, dtype=jnp.float32)   # (TB, E) f32 acc
    vo_raw = jnp.sum(bert * obj_b, axis=1, dtype=jnp.float32)    # (TB, E)
    subj_sum = jnp.sum(subj, axis=1, keepdims=True)              # (TB, 1) exact f32
    obj_sum = jnp.sum(obj, axis=1, keepdims=True)

    wp = wp_ref[...]                                     # (E, H) bf16
    bp = bp_ref[...]                                     # (1, H) f32
    if TB % 8 == 0:
        # One Wp weight push on the MXU serves both pooled operands.
        pooled = jnp.concatenate([vs_raw, vo_raw], axis=0).astype(cdt)  # (2TB, E)
        proj = jnp.dot(pooled, wp, preferred_element_type=jnp.float32)  # (2TB, H)
        vs = proj[:TB] + subj_sum * bp                   # (TB, H)
        vo = proj[TB:] + obj_sum * bp
    else:
        # TB not sublane-aligned: keep two dots (avoids an unaligned sublane
        # concat relayout); only taken for tiny batches.
        vs = jnp.dot(vs_raw.astype(cdt), wp,
                     preferred_element_type=jnp.float32) + subj_sum * bp
        vo = jnp.dot(vo_raw.astype(cdt), wp,
                     preferred_element_type=jnp.float32) + obj_sum * bp

    # --- Bilinear head: one MXU push + sublane-broadcast mul + lane reduce. --
    t = jnp.dot(vs.astype(cdt), wbl2_ref[...],
                preferred_element_type=jnp.float32)      # (TB, R*H) f32
    prod = t.reshape(TB, R, H) * vo[:, None, :]          # (TB, R, H) f32
    out_ref[...] = jnp.sum(prod, axis=-1) + bbl_ref[...]  # (TB, R)


def _default_pool_dtype():
    try:
        kind = jax.devices()[0].device_kind.lower()
    except Exception:
        kind = ""
    # v5e/v5p have no bf16 VALU -> keep the big pooling multiply in f32 there;
    # v6e/v7x multiply natively in bf16 (f32 accumulation either way).
    return jnp.float32 if "v5" in kind else jnp.bfloat16


def _pick_block_b(B):
    """Batch tile: sublane-aligned, <=128 rows (v7x 64 MiB VMEM), divisor of B
    so bert_out is never host-padded in the common case, and >=2 grid steps
    when the batch allows (v7x has 2 TensorCores)."""
    if B <= 128:
        half = B // 2
        if half >= 8 and half % 8 == 0:       # nb = 2 without padding
            return half
        return B                               # whole batch in one step
    cands = [d for d in range(8, 129, 8) if B % d == 0]
    return max(cands) if cands else 128        # fallback pads (extra HBM copy)


def sbert_forward(bert_out, subj_map, obj_map, wp, bp, wbl, bbl, *, block_b=None):
    """Post-BERT SBERT forward (projection + mention pooling + bilinear head)."""
    B, S, E = bert_out.shape
    H = wp.shape[1]
    R = wbl.shape[0]

    if block_b is None:
        block_b = _pick_block_b(B)
    nb = -(-B // block_b)
    Bp = nb * block_b
    if Bp != B:
        # Only reached when B has no multiple-of-8 divisor <= 128; padding
        # bert_out costs one extra HBM round-trip of the largest tensor.
        pad = Bp - B
        bert_out = jnp.pad(bert_out, ((0, pad), (0, 0), (0, 0)))
        subj_map = jnp.pad(subj_map, ((0, pad), (0, 0)))
        obj_map = jnp.pad(obj_map, ((0, pad), (0, 0)))

    pool_dt = _default_pool_dtype()

    # bf16 streams (halve HBM bytes, native MXU dtype); maps / biases stay f32.
    bert_bf = bert_out.astype(jnp.bfloat16)
    wp_bf = wp.astype(jnp.bfloat16)
    # Bilinear weight (R, H, H) -> (H, R*H): wbl2[i, r*H + j] = wbl[r, i, j]
    wbl2 = jnp.transpose(wbl, (1, 0, 2)).reshape(H, R * H).astype(jnp.bfloat16)
    subj2 = subj_map.astype(jnp.float32)                 # (Bp, S) 2-D, no pad blow-up
    obj2 = obj_map.astype(jnp.float32)
    bp2 = bp.reshape(1, H).astype(jnp.float32)
    bbl2 = bbl.reshape(1, R).astype(jnp.float32)

    # VMEM budget: double-buffered streams + in-kernel temporaries (+ slack).
    pool_bytes = 2 if pool_dt == jnp.bfloat16 else 4
    stream = (block_b * S * E * 2 + 2 * block_b * S * 4
              + E * H * 2 + H * R * H * 2 + (H + R) * 4 + block_b * R * 4)
    temps = (block_b * S * E * (pool_bytes + 4)          # cast/product + f32 reduce temp
             + 2 * block_b * (E + H + R * H) * 4)        # pooled / proj / bilinear temps
    vmem_limit = int(min(96 << 20, max(32 << 20, 2 * stream + temps + (4 << 20))))

    kernel = functools.partial(sbert_head_kernel, pool_dtype=pool_dt)
    out = pl.pallas_call(
        kernel,
        out_shape=jax.ShapeDtypeStruct((Bp, R), jnp.float32),
        grid=(nb,),
        in_specs=[
            pl.BlockSpec((block_b, S, E), lambda b: (b, 0, 0)),   # bert_out (bf16)
            pl.BlockSpec((block_b, S), lambda b: (b, 0)),         # subj_map (f32)
            pl.BlockSpec((block_b, S), lambda b: (b, 0)),         # obj_map  (f32)
            pl.BlockSpec((E, H), lambda b: (0, 0)),               # projection W (bf16)
            pl.BlockSpec((1, H), lambda b: (0, 0)),               # projection b
            pl.BlockSpec((H, R * H), lambda b: (0, 0)),           # bilinear W (fused)
            pl.BlockSpec((1, R), lambda b: (0, 0)),               # bilinear b
        ],
        out_specs=pl.BlockSpec((block_b, R), lambda b: (b, 0)),
        compiler_params=pltpu.CompilerParams(
            dimension_semantics=("parallel",),
            vmem_limit_bytes=vmem_limit),
    )(bert_bf, subj2, obj2, wp_bf, bp2, wbl2, bbl2)
    return out[:B]


def sbert_forward_ref(bert_out, subj_map, obj_map, wp, bp, wbl, bbl):
    """Pure-JAX f32 reference matching the PyTorch forward semantics."""
    ctx = jnp.einsum('bse,eh->bsh', bert_out, wp) + bp           # projection_layer
    vs = jnp.einsum('bs,bsh->bh', subj_map, ctx)                 # bmm + squeeze
    vo = jnp.einsum('bs,bsh->bh', obj_map, ctx)
    return jnp.einsum('bi,rij,bj->br', vs, wbl, vo) + bbl        # nn.Bilinear


if __name__ == "__main__":
    # Small, module-consistent shapes.
    B, S = 2, 16          # batch, sequence length
    E = 768               # bert_hidden (fixed at 768 in the module)
    H = 128               # args.hidden
    R = 8                 # len(rel2id)
    V = 64                # synthetic vocab size for the BERT stand-in

    key = jax.random.PRNGKey(0)
    k_words, k_emb, k_smap, k_omap, k_wp, k_bp, k_wbl, k_bbl = jax.random.split(key, 8)

    # Inputs (words, subj_map, obj_map) — as in the PyTorch forward.
    words = jax.random.randint(k_words, (B, S), 0, V, dtype=jnp.int32)
    subj_map = jax.nn.softmax(jax.random.normal(k_smap, (B, S), jnp.float32), axis=-1)
    obj_map = jax.nn.softmax(jax.random.normal(k_omap, (B, S), jnp.float32), axis=-1)

    # TODO(synk): BertModel stand-in — deterministic embedding lookup instead of
    # the pretrained 12-layer encoder.
    emb_table = 0.02 * jax.random.normal(k_emb, (V, E), jnp.float32)
    bert_out = emb_table[words]                                  # (B, S, E)

    # Parameters (deterministic, shapes from __init__):
    #   projection_layer: Linear(768 -> hidden)
    wp = 0.02 * jax.random.normal(k_wp, (E, H), jnp.float32)
    bp = 0.02 * jax.random.normal(k_bp, (H,), jnp.float32)
    #   flinear: Bilinear(hidden, hidden, len(rel2id)); weight.normal_(std=0.001)
    wbl = 0.001 * jax.random.normal(k_wbl, (R, H, H), jnp.float32)
    bbl = 0.01 * jax.random.normal(k_bbl, (R,), jnp.float32)

    out = sbert_forward(bert_out, subj_map, obj_map, wp, bp, wbl, bbl)
    out = jax.block_until_ready(out)

    ref = sbert_forward_ref(bert_out, subj_map, obj_map, wp, bp, wbl, bbl)
    # Kernel streams bert_out / weights (and, on v6e/v7x, the pooling multiply)
    # in bf16; reference stays f32 -> loosened tolerance.
    np.testing.assert_allclose(np.asarray(out), np.asarray(ref),
                               rtol=2e-2, atol=2e-4)

    print("KERNEL_OK")
</pallas_src>

<mosaic_0001>
module attributes {stable_mosaic.version = 11 : i64} {
  func.func @sbert_head_kernel(%arg0: i32, %arg1: memref<2x16x768xbf16, #tpu.memory_space<vmem>>, %arg2: memref<2x16xf32, #tpu.memory_space<vmem>>, %arg3: memref<2x16xf32, #tpu.memory_space<vmem>>, %arg4: memref<768x128xbf16, #tpu.memory_space<vmem>>, %arg5: memref<1x128xf32, #tpu.memory_space<vmem>>, %arg6: memref<128x1024xbf16, #tpu.memory_space<vmem>>, %arg7: memref<1x8xf32, #tpu.memory_space<vmem>>, %arg8: memref<2x8xf32, #tpu.memory_space<vmem>>) attributes {dimension_semantics = [#tpu.dimension_semantics<parallel>], iteration_bounds = array<i64: 1>, scalar_prefetch = 0 : i64, scratch_operands = 0 : i64, tpu.core_type = #tpu.core_type<tc>, window_params = [{transform_indices = @transform_0, window_bounds = array<i64: 2, 16, 768>}, {transform_indices = @transform_1, window_bounds = array<i64: 2, 16>}, {transform_indices = @transform_2, window_bounds = array<i64: 2, 16>}, {pipeline_mode = #tpu.pipeline_mode<synchronous>, transform_indices = @transform_3, window_bounds = array<i64: 768, 128>}, {pipeline_mode = #tpu.pipeline_mode<synchronous>, transform_indices = @transform_4, window_bounds = array<i64: 1, 128>}, {pipeline_mode = #tpu.pipeline_mode<synchronous>, transform_indices = @transform_5, window_bounds = array<i64: 128, 1024>}, {pipeline_mode = #tpu.pipeline_mode<synchronous>, transform_indices = @transform_6, window_bounds = array<i64: 1, 8>}, {transform_indices = @transform_7, window_bounds = array<i64: 2, 8>}]} {
    %c0 = arith.constant 0 : index
    %c0_0 = arith.constant 0 : index
    %c0_1 = arith.constant 0 : index
    %0 = vector.load %arg1[%c0, %c0_0, %c0_1] : memref<2x16x768xbf16, #tpu.memory_space<vmem>>, vector<2x16x768xbf16>
    %c0_2 = arith.constant 0 : index
    %c0_3 = arith.constant 0 : index
    %1 = vector.load %arg2[%c0_2, %c0_3] : memref<2x16xf32, #tpu.memory_space<vmem>>, vector<2x16xf32>
    %c0_4 = arith.constant 0 : index
    %c0_5 = arith.constant 0 : index
    %2 = vector.load %arg3[%c0_4, %c0_5] : memref<2x16xf32, #tpu.memory_space<vmem>>, vector<2x16xf32>
    %3 = arith.truncf %1 : vector<2x16xf32> to vector<2x16xbf16>
    %4 = vector.shape_cast %3 : vector<2x16xbf16> to vector<2x16x1xbf16>
    %5 = arith.truncf %2 : vector<2x16xf32> to vector<2x16xbf16>
    %6 = vector.shape_cast %5 : vector<2x16xbf16> to vector<2x16x1xbf16>
    %7 = vector.broadcast %4 : vector<2x16x1xbf16> to vector<2x16x768xbf16>
    %8 = arith.mulf %0, %7 : vector<2x16x768xbf16>
    %9 = arith.extf %8 : vector<2x16x768xbf16> to vector<2x16x768xf32>
    %cst = arith.constant dense<0.000000e+00> : vector<2x768xf32>
    %10 = vector.multi_reduction <add>, %9, %cst [1] : vector<2x16x768xf32> to vector<2x768xf32>
    %11 = vector.broadcast %6 : vector<2x16x1xbf16> to vector<2x16x768xbf16>
    %12 = arith.mulf %0, %11 : vector<2x16x768xbf16>
    %13 = arith.extf %12 : vector<2x16x768xbf16> to vector<2x16x768xf32>
    %cst_6 = arith.constant dense<0.000000e+00> : vector<2x768xf32>
    %14 = vector.multi_reduction <add>, %13, %cst_6 [1] : vector<2x16x768xf32> to vector<2x768xf32>
    %cst_7 = arith.constant dense<0.000000e+00> : vector<2xf32>
    %15 = vector.multi_reduction <add>, %1, %cst_7 [1] : vector<2x16xf32> to vector<2xf32>
    %16 = vector.shape_cast %15 : vector<2xf32> to vector<2x1xf32>
    %cst_8 = arith.constant dense<0.000000e+00> : vector<2xf32>
    %17 = vector.multi_reduction <add>, %2, %cst_8 [1] : vector<2x16xf32> to vector<2xf32>
    %18 = vector.shape_cast %17 : vector<2xf32> to vector<2x1xf32>
    %c0_9 = arith.constant 0 : index
    %c0_10 = arith.constant 0 : index
    %19 = vector.load %arg4[%c0_9, %c0_10] : memref<768x128xbf16, #tpu.memory_space<vmem>>, vector<768x128xbf16>
    %c0_11 = arith.constant 0 : index
    %c0_12 = arith.constant 0 : index
    %20 = vector.load %arg5[%c0_11, %c0_12] : memref<1x128xf32, #tpu.memory_space<vmem>>, vector<1x128xf32>
    %21 = arith.truncf %10 : vector<2x768xf32> to vector<2x768xbf16>
    %cst_13 = arith.constant dense<0.000000e+00> : vector<2x128xf32>
    %22 = tpu.matmul %21, %19, %cst_13 {dimension_numbers = #tpu.dot_dimension_numbers<[1], [0], [0], [1], [0, 0, 1, 1], [], []>} : vector<2x768xbf16>, vector<768x128xbf16>, vector<2x128xf32> -> vector<2x128xf32>
    %23 = vector.broadcast %16 : vector<2x1xf32> to vector<2x128xf32>
    %24 = vector.broadcast %20 : vector<1x128xf32> to vector<2x128xf32>
    %25 = arith.mulf %23, %24 : vector<2x128xf32>
    %26 = arith.addf %22, %25 : vector<2x128xf32>
    %27 = arith.truncf %14 : vector<2x768xf32> to vector<2x768xbf16>
    %cst_14 = arith.constant dense<0.000000e+00> : vector<2x128xf32>
    %28 = tpu.matmul %27, %19, %cst_14 {dimension_numbers = #tpu.dot_dimension_numbers<[1], [0], [0], [1], [0, 0, 1, 1], [], []>} : vector<2x768xbf16>, vector<768x128xbf16>, vector<2x128xf32> -> vector<2x128xf32>
    %29 = vector.broadcast %18 : vector<2x1xf32> to vector<2x128xf32>
    %30 = vector.broadcast %20 : vector<1x128xf32> to vector<2x128xf32>
    %31 = arith.mulf %29, %30 : vector<2x128xf32>
    %32 = arith.addf %28, %31 : vector<2x128xf32>
    %33 = arith.truncf %26 : vector<2x128xf32> to vector<2x128xbf16>
    %c0_15 = arith.constant 0 : index
    %c0_16 = arith.constant 0 : index
    %34 = vector.load %arg6[%c0_15, %c0_16] : memref<128x1024xbf16, #tpu.memory_space<vmem>>, vector<128x1024xbf16>
    %cst_17 = arith.constant dense<0.000000e+00> : vector<2x1024xf32>
    %35 = tpu.matmul %33, %34, %cst_17 {dimension_numbers = #tpu.dot_dimension_numbers<[1], [0], [0], [1], [0, 0, 1, 1], [], []>} : vector<2x128xbf16>, vector<128x1024xbf16>, vector<2x1024xf32> -> vector<2x1024xf32>
    %36 = vector.shape_cast %35 : vector<2x1024xf32> to vector<2x8x128xf32>
    %37 = vector.shape_cast %32 : vector<2x128xf32> to vector<2x1x128xf32>
    %38 = vector.broadcast %37 : vector<2x1x128xf32> to vector<2x8x128xf32>
    %39 = arith.mulf %36, %38 : vector<2x8x128xf32>
    %cst_18 = arith.constant dense<0.000000e+00> : vector<2x8xf32>
    %40 = vector.multi_reduction <add>, %39, %cst_18 [2] : vector<2x8x128xf32> to vector<2x8xf32>
    %c0_19 = arith.constant 0 : index
    %c0_20 = arith.constant 0 : index
    %41 = vector.load %arg7[%c0_19, %c0_20] : memref<1x8xf32, #tpu.memory_space<vmem>>, vector<1x8xf32>
    %42 = vector.broadcast %41 : vector<1x8xf32> to vector<2x8xf32>
    %43 = arith.addf %40, %42 : vector<2x8xf32>
    %c0_21 = arith.constant 0 : index
    %c0_22 = arith.constant 0 : index
    %44 = vector.load %arg8[%c0_21, %c0_22] : memref<2x8xf32, #tpu.memory_space<vmem>>, vector<2x8xf32>
    tpu.vector_store %arg8[%c0_21, %c0_22], %43 {strides = array<i32>} : memref<2x8xf32, #tpu.memory_space<vmem>>, vector<2x8xf32>,
    return
  }
  func.func @transform_0(%arg0: i32) -> (i32, i32, i32) {
    %c0_i32 = arith.constant 0 : i32
    %c0_i32_0 = arith.constant 0 : i32
    %c0_i32_1 = arith.constant 0 : i32
    return %arg0, %c0_i32, %c0_i32_0 : i32, i32, i32
  }
  func.func @transform_1(%arg0: i32) -> (i32, i32) {
    %c0_i32 = arith.constant 0 : i32
    %c0_i32_0 = arith.constant 0 : i32
    return %arg0, %c0_i32 : i32, i32
  }
  func.func @transform_2(%arg0: i32) -> (i32, i32) {
    %c0_i32 = arith.constant 0 : i32
    %c0_i32_0 = arith.constant 0 : i32
    return %arg0, %c0_i32 : i32, i32
  }
  func.func @transform_3(%arg0: i32) -> (i32, i32) {
    %c0_i32 = arith.constant 0 : i32
    %c0_i32_0 = arith.constant 0 : i32
    %c0_i32_1 = arith.constant 0 : i32
    return %c0_i32, %c0_i32_0 : i32, i32
  }
  func.func @transform_4(%arg0: i32) -> (i32, i32) {
    %c0_i32 = arith.constant 0 : i32
    %c0_i32_0 = arith.constant 0 : i32
    %c0_i32_1 = arith.constant 0 : i32
    return %c0_i32, %c0_i32_0 : i32, i32
  }
  func.func @transform_5(%arg0: i32) -> (i32, i32) {
    %c0_i32 = arith.constant 0 : i32
    %c0_i32_0 = arith.constant 0 : i32
    %c0_i32_1 = arith.constant 0 : i32
    return %c0_i32, %c0_i32_0 : i32, i32
  }
  func.func @transform_6(%arg0: i32) -> (i32, i32) {
    %c0_i32 = arith.constant 0 : i32
    %c0_i32_0 = arith.constant 0 : i32
    %c0_i32_1 = arith.constant 0 : i32
    return %c0_i32, %c0_i32_0 : i32, i32
  }
  func.func @transform_7(%arg0: i32) -> (i32, i32) {
    %c0_i32 = arith.constant 0 : i32
    %c0_i32_0 = arith.constant 0 : i32
    return %arg0, %c0_i32 : i32, i32
  }
}

</mosaic_0001>

<bundles_post_ra>
// kernel: tpu_custom_call.1
= control target key start
LH: loop header
LB: loop body
LE: loop exit
PB: predicated region body
PF: predicated region fallthrough
CT: control target
= control target key end

     0   :  { %12 = vsyncpa [#allocation3], 0  ;;  %s2728_s0 = inlined_call_operand.hbm [shape: bf16[2,16,768], index: 0, kind: input, shape index: {}]   ;;  %s2729_s1 = inlined_call_operand.vmem [shape: f32[2,16], index: 1, kind: input, shape index: {}]   ;;  %s2730_s2 = inlined_call_operand.vmem [shape: f32[2,16], index: 2, kind: input, shape index: {}]   ;;  %s2731_s3 = inlined_call_operand.hbm [shape: bf16[768,128], index: 3, kind: input, shape index: {}]   ;;  %s2732_s4 = inlined_call_operand.vmem [shape: f32[1,128], index: 4, kind: input, shape index: {}]   ;;  %s2733_s5 = inlined_call_operand.hbm [shape: bf16[128,1024], index: 5, kind: input, shape index: {}]   ;;  %s2734_s6 = inlined_call_operand.vmem [shape: f32[1,8], index: 6, kind: input, shape index: {}]   ;;  %s2735_s7 = inlined_call_operand.hbm [shape: f32[2,8], index: 7, kind: output, shape index: {}]  }
   0x1   :  { %13 = vsyncpa [#allocation6], 0 }
   0x2   :  { %14 = vsyncpa [#allocation4], 0  ;;  %s2276_s24 = smov [#allocation5]   ;;  %s2182_s28 = scalar_lea.hbm %s2731_s3, 6144 }
   0x3   :  { %s36_s25 = sshll.u32 %s2276_s24, 4  ;;  %p2183_p0 = scmp.ne.s32.totalorder %s2731_s3, %s2182_s28  ;;  %s37_s25 = int_to_ptr.vmem [resolvable:$true] %s36_s25 }
   0x4   :  { %p2186_p1 = scmp.lt.u32.totalorder %s2182_s28, %s2731_s3 }
   0x6   :  { %p2188_p2 = pnand %p2186_p1, %p2183_p0 }
   0x8   :  { %2191 = shalt.err (!%p2188_p2)
}
   0x9   :  { %s2192_s10 = scalar_lea.vmem %s37_s25, 6144  ;;  %p2197_p4 = scmp.lt.s32.totalorder %s37_s25, %s37_s25 }
   0xa   :  { %p2193_p3 = scmp.ne.s32.totalorder %s37_s25, %s2192_s10  ;;  %p2198_p5 = scmp.lt.s32.totalorder %s2192_s10, %s2192_s10 }
   0xc   :  { %p2199_p6 = por %p2198_p5, %p2197_p4 }
   0xe   :  { %p2200_p7 = pnand %p2199_p6, %p2193_p3 }
  0x10   :  { %2203 = shalt.err (!%p2200_p7)
}
  0x11   :  { %s2277_s11 = smov 64   ;;  %s2278_s12 = smov 4  }
  0x12   :  { %42 = dma.hbm_to_vmem [thread:$0]  %s2731_s3, 6144, %s37_s25, [#allocation6], %s2277_s11, %s2277_s11, %s2278_s12  }
  0x13   :  { %s2279_s15 = smov [#allocation2]   ;;  %s2204_s19 = scalar_lea.hbm %s2728_s0, 1536 }
  0x14   :  { %s20_s16 = sshll.u32 %s2279_s15, 4  ;;  %p2205_p8 = scmp.ne.s32.totalorder %s2728_s0, %s2204_s19  ;;  %s21_s16 = int_to_ptr.vmem [resolvable:$true] %s20_s16 }
  0x15   :  { %p2208_p9 = scmp.lt.u32.totalorder %s2204_s19, %s2728_s0 }
  0x17   :  { %p2210_p10 = pnand %p2208_p9, %p2205_p8 }
  0x19   :  { %2213 = shalt.err (!%p2210_p10)
}
  0x1a   :  { %s2214_s24 = scalar_lea.vmem %s21_s16, 1536  ;;  %p2219_p12 = scmp.lt.s32.totalorder %s21_s16, %s21_s16 }
  0x1b   :  { %p2215_p11 = scmp.ne.s32.totalorder %s21_s16, %s2214_s24  ;;  %p2220_p13 = scmp.lt.s32.totalorder %s2214_s24, %s2214_s24 }
  0x1d   :  { %p2221_p0 = por %p2220_p13, %p2219_p12 }
  0x1f   :  { %p2222_p1 = pnand %p2221_p0, %p2215_p11 }
  0x21   :  { %2225 = shalt.err (!%p2222_p1)
}
  0x22   :  { %s2280_s3 = smov 384   ;;  %s2281_s25 = smov 24  }
  0x23   :  { %26 = dma.hbm_to_vmem [thread:$0]  %s2728_s0, 1536, %s21_s16, [#allocation3], %s2280_s3, %s2280_s3, %s2281_s25  }
  0x24   :  { %s2282_s28 = smov [#allocation7]   ;;  %s2226_s9 = scalar_lea.hbm %s2733_s5, 8192 }
  0x25   :  { %s50_s29 = sshll.u32 %s2282_s28, 4  ;;  %p2227_p2 = scmp.ne.s32.totalorder %s2733_s5, %s2226_s9  ;;  %s51_s29 = int_to_ptr.vmem [resolvable:$true] %s50_s29 }
  0x26   :  { %p2230_p3 = scmp.lt.u32.totalorder %s2226_s9, %s2733_s5 }
  0x28   :  { %p2232_p4 = pnand %p2230_p3, %p2227_p2 }
  0x2a   :  { %2235 = shalt.err (!%p2232_p4)
}
  0x2b   :  { %s2236_s14 = scalar_lea.vmem %s51_s29, 8192  ;;  %p2241_p6 = scmp.lt.s32.totalorder %s51_s29, %s51_s29 }
  0x2c   :  { %p2237_p5 = scmp.ne.s32.totalorder %s51_s29, %s2236_s14  ;;  %p2242_p7 = scmp.lt.s32.totalorder %s2236_s14, %s2236_s14 }
  0x2e   :  { %p2243_p8 = por %p2242_p7, %p2241_p6 }
  0x30   :  { %p2244_p9 = pnand %p2243_p8, %p2237_p5 }
  0x32   :  { %2247 = shalt.err (!%p2244_p9)
}
  0x33   :  { %s2283_s0 = smov 512   ;;  %s2284_s15 = smov 32  }
  0x34   :  { %56 = dma.hbm_to_vmem [thread:$0]  %s2733_s5, 8192, %s51_s29, [#allocation6], %s2283_s0, %s2283_s0, %s2284_s15  }
  0x35   :  { %2270 = dma.done.wait [#allocation3], 1536  }
  0x36   :  { %2271 = vsyncadd [#allocation3], 4294965760 }
  0x37   :  { %2272 = dma.done.wait [#allocation6], 14336  }
  0x38   :  { %2273 = vsyncadd [#allocation6], 4294952960  ;;  %v2736_v0 = vlaneseq  ;;  %v2374_v2 = vld [vmem:[%s2729_s1] sm:$0x3]  ;;  %v2394_v14 = vld [vmem:[#allocation5 + $0x48] sm:$0xff]   ;;  %vm433_vm0 = vcmask 123904  }
  0x39   :  { %v83_v3 = vpack.c.bf16 %v2374_v2, %v2374_v2  ;;  %v2381_v5 = vld [vmem:[#allocation5 + $0x40] sm:$0xff]   ;;  %v2398_v15 = vld [vmem:[#allocation5 + $0x8] sm:$0xff]   ;;  %v2406_v18 = vld [vmem:[#allocation5 + $0x50] sm:$0xff]   ;;  %v434_v50 = vsel %vm433_vm0, %v2374_v2, 0.0  ;;  %v2285_v51 = vmov 839922192  }
  0x3a   :  { %v2369_v1 = vshrl.u32 %v2736_v0, 7  ;;  %1984 = vmatprep.subr.bf16.mxu0 %v2381_v5  ;;  %v2384_v8 = vld [vmem:[#allocation5] sm:$0xff]   ;;  %v2400_v16 = vld [vmem:[#allocation5 + $0xc8] sm:$0xff]   ;;  %v2409_v19 = vld [vmem:[#allocation5 + $0x10] sm:$0xff]   ;;  %v128_v52 = vunpack.c.l.s4 %v2285_v51  ;;  %v2286_v53 = vmov 1985246804  }
  0x3b   :  { %v85_v6 = vpack.i.b16 %v83_v3, %v83_v3  ;;  %v94_v7 = vshrl.u32 %v83_v3, 16  ;;  %v2387_v11 = vld [vmem:[#allocation5 + $0xc0] sm:$0xff]   ;;  %1985 = vmatpush3.bf16.msra.mxu0 %v2384_v8  ;;  %2767 = vst [vmem:[#allocation16_spill] sm:$0xff] %v2400_v16  ;;  %v2403_v17 = vld [vmem:[#allocation5 + $0x88] sm:$0xff]   ;;  %v2412_v20 = vld [vmem:[#allocation5 + $0xd0] sm:$0xff]   ;;  %v135_v54 = vunpack.c.l.s4 %v2286_v53  ;;  %vm580_vm1 = vcmask 1041409  }
  0x3c   :  { %2763 = vst [vmem:[#allocation12_spill] sm:$0xff] %v2369_v1  ;;  %v2379_v4 = vsub.s32 0, %v2369_v1  ;;  %2765 = vst [vmem:[#allocation14_spill] sm:$0xff] %v2387_v11  ;;  %v2390_v12 = vld [vmem:[#allocation5 + $0x80] sm:$0xff]   ;;  %2006 = vmatprep.subr.bf16.mxu1 %v2387_v11  ;;  %1986 = vmatprep.subr.bf16.mxu0 %v2394_v14  ;;  %v2415_v21 = vld [vmem:[#allocation5 + $0x90] sm:$0xff]   ;;  %v129_v55 = vunpack.c.0.s8 %v128_v52  ;;  %vm1852_vm2 = vcmask 58368  }
  0x3d   :  { %v95_v10 = vpack.i.b16 %v94_v7, %v94_v7  ;;  %2766 = vst [vmem:[#allocation15_spill] sm:$0xff] %v2390_v12  ;;  %2007 = vmatpush3.bf16.msra.mxu1 %v2390_v12  ;;  %2768 = vst [vmem:[#allocation17_spill] sm:$0xff] %v2403_v17  ;;  %v2418_v22 = vld [vmem:[#allocation5 + $0x58] sm:$0xff]   ;;  %v2430_v26 = vld [vmem:[#allocation5 + $0x60] sm:$0xff]   ;;  %v136_v56 = vunpack.c.0.s8 %v135_v54 }
  0x3e   :  { %2764 = vst [vmem:[#allocation13_spill] sm:$0xff] %v2379_v4  ;;  %v90_v9 = vrot.slane %v85_v6, %v2379_v4  ;;  %2008 = vmatprep.subr.bf16.mxu1 %v2400_v16  ;;  %2769 = vst [vmem:[#allocation18_spill] sm:$0xff] %v2412_v20  ;;  %v2421_v23 = vld [vmem:[#allocation5 + $0x18] sm:$0xff]   ;;  %v2433_v27 = vld [vmem:[#allocation5 + $0x20] sm:$0xff]   ;;  %v2495_v57 = vsub.s32 %v129_v55, %v2369_v1 }
  0x3f   :  { %v100_v13 = vrot.slane %v95_v10, %v2379_v4  ;;  %1987 = vmatpush3.bf16.msra.mxu0 %v2398_v15  ;;  %2770 = vst [vmem:[#allocation19_spill] sm:$0xff] %v2415_v21  ;;  %v2424_v24 = vld [vmem:[#allocation5 + $0xd8] sm:$0xff]   ;;  %v2436_v28 = vld [vmem:[#allocation5 + $0xe0] sm:$0xff]   ;;  %v2442_v30 = vld [vmem:[#allocation5 + $0x68] sm:$0xff]   ;;  %v2498_v58 = vsub.s32 %v136_v56, %v2369_v1 }
  0x40   :  { %92 = vbcast.lane.c.b16.xlu0 %v90_v9, 256  ;;  %1988 = vmatprep.subr.bf16.mxu0 %v2406_v18  ;;  %2771 = vst [vmem:[#allocation20_spill] sm:$0xff] %v2424_v24  ;;  %v2427_v25 = vld [vmem:[#allocation5 + $0x98] sm:$0xff]   ;;  %2773 = vst [vmem:[#allocation22_spill] sm:$0xff] %v2436_v28  ;;  %v2439_v29 = vld [vmem:[#allocation5 + $0xa0] sm:$0xff]  }
  0x41   :  { %2009 = vmatpush3.bf16.msra.mxu1 %v2403_v17  ;;  %2772 = vst [vmem:[#allocation21_spill] sm:$0xff] %v2427_v25  ;;  %2774 = vst [vmem:[#allocation23_spill] sm:$0xff] %v2439_v29  ;;  %v2445_v31 = vld [vmem:[#allocation5 + $0x28] sm:$0xff]   ;;  %v2454_v34 = vld [vmem:[#allocation5 + $0x70] sm:$0xff]  }
  0x42   :  { %2010 = vmatprep.subr.bf16.mxu1 %v2412_v20  ;;  %v2448_v32 = vld [vmem:[#allocation5 + $0xe8] sm:$0xff]   ;;  %2777 = vst [vmem:[#allocation26_spill] sm:$0xff] %v2454_v34  ;;  %v2457_v35 = vld [vmem:[#allocation5 + $0x30] sm:$0xff]   ;;  %v2468_v38 = vld [vmem:[%s2730_s2] sm:$0x3] }
  0x43   :  { %1989 = vmatpush3.bf16.msra.mxu0 %v2409_v19  ;;  %2775 = vst [vmem:[#allocation24_spill] sm:$0xff] %v2448_v32  ;;  %v2451_v33 = vld [vmem:[#allocation5 + $0xa8] sm:$0xff]   ;;  %2778 = vst [vmem:[#allocation27_spill] sm:$0xff] %v2457_v35  ;;  %v2460_v36 = vld [vmem:[#allocation5 + $0xf0] sm:$0xff]   ;;  %v104_v39 = vpack.c.bf16 %v2468_v38, %v2468_v38 }
  0x44   :  { %102 = vbcast.lane.c.b16.xlu0 %v100_v13, 256  ;;  %1990 = vmatprep.subr.bf16.mxu0 %v2418_v22  ;;  %2776 = vst [vmem:[#allocation25_spill] sm:$0xff] %v2451_v33  ;;  %2779 = vst [vmem:[#allocation28_spill] sm:$0xff] %v2460_v36  ;;  %v2463_v37 = vld [vmem:[#allocation5 + $0xb0] sm:$0xff]   ;;  %v2473_v40 = vld [vmem:[#allocation5 + $0x78] sm:$0xff]  }
  0x45   :  { %2011 = vmatpush3.bf16.msra.mxu1 %v2415_v21  ;;  %2780 = vst [vmem:[#allocation29_spill] sm:$0xff] %v2463_v37  ;;  %2781 = vst [vmem:[#allocation30_spill] sm:$0xff] %v2468_v38  ;;  %v2476_v41 = vld [vmem:[#allocation5 + $0x38] sm:$0xff]   ;;  %v106_v42 = vpack.i.b16 %v104_v39, %v104_v39  ;;  %v115_v44 = vshrl.u32 %v104_v39, 16  ;;  %v2486_v48 = vld [vmem:[#allocation5 + $0x140] sm:$0xff]  }
  0x46   :  { %2012 = vmatprep.subr.bf16.mxu1 %v2424_v24  ;;  %2782 = vst [vmem:[#allocation31_spill] sm:$0xff] %v2473_v40  ;;  %2783 = vst [vmem:[#allocation32_spill] sm:$0xff] %v2476_v41  ;;  %v2479_v43 = vld [vmem:[#allocation5 + $0xf8] sm:$0xff]   ;;  %v2500_v59 = vld [vmem:[#allocation2] sm:$0xff] }
  0x47   :  { %1991 = vmatpush3.bf16.msra.mxu0 %v2421_v23  ;;  %2784 = vst [vmem:[#allocation33_spill] sm:$0xff] %v2479_v43  ;;  %v2482_v45 = vld [vmem:[#allocation5 + $0xb8] sm:$0xff]   ;;  %v111_v46 = vrot.slane %v106_v42, %v2379_v4  ;;  %v116_v47 = vpack.i.b16 %v115_v44, %v115_v44  ;;  %2786 = vst [vmem:[#allocation35_spill] sm:$0xff] %v2486_v48  ;;  %v2502_v61 = vld [vmem:[#allocation2 + $0x8] sm:$0xff] }
  0x48   :  { %1992 = vmatprep.subr.bf16.mxu0 %v2430_v26  ;;  %2785 = vst [vmem:[#allocation34_spill] sm:$0xff] %v2482_v45  ;;  %v2504_v62 = vld [vmem:[#allocation2 + $0x10] sm:$0xff]  ;;  %v2506_v63 = vld [vmem:[#allocation2 + $0x18] sm:$0xff]  ;;  %v2508_v2 = vld [vmem:[#allocation2 + $0x20] sm:$0xff] }
  0x49   :  { %2013 = vmatpush3.bf16.msra.mxu1 %v2427_v25  ;;  %113 = vbcast.lane.c.b16.xlu1 %v111_v46, 256  ;;  %v121_v49 = vrot.slane %v116_v47, %v2379_v4  ;;  %v2510_v3 = vld [vmem:[#allocation2 + $0x28] sm:$0xff]  ;;  %v2520_v0 = vld [vmem:[#allocation2 + $0x30] sm:$0xff]  ;;  %v2524_v4 = vld [vmem:[#allocation2 + $0x40] sm:$0xff] }
  0x4a   :  { %2014 = vmatprep.subr.bf16.mxu1 %v2436_v28  ;;  %v2526_v38 = vld [vmem:[#allocation2 + $0x48] sm:$0xff] }
  0x4b   :  { %1993 = vmatpush3.bf16.msra.mxu0 %v2433_v27 }
  0x4c   :  { %1994 = vmatprep.subr.bf16.mxu0 %v2442_v30 }
  0x4d   :  { %2015 = vmatpush3.bf16.msra.mxu1 %v2439_v29  ;;  %123 = vbcast.lane.c.b16.xlu1 %v121_v49, 256 }
  0x4e   :  { %2016 = vmatprep.subr.bf16.mxu1 %v2448_v32 }
  0x4f   :  { %1995 = vmatpush3.bf16.msra.mxu0 %v2445_v31 }
  0x50   :  { %1996 = vmatprep.subr.bf16.mxu0 %v2454_v34 }
  0x51   :  { %2017 = vmatpush3.bf16.msra.mxu1 %v2451_v33 }
  0x52   :  { %2018 = vmatprep.subr.bf16.mxu1 %v2460_v36 }
  0x53   :  { %1997 = vmatpush3.bf16.msra.mxu0 %v2457_v35 }
  0x54   :  { %1998 = vmatprep.subr.bf16.mxu0 %v2473_v40 }
  0x55   :  { %2019 = vmatpush3.bf16.msra.mxu1 %v2463_v37  ;;  %v2530_v37 = vld [vmem:[#allocation2 + $0x50] sm:$0xff] }
  0x56   :  { %2020 = vmatprep.subr.bf16.mxu1 %v2479_v43 }
  0x57   :  { %1999 = vmatpush3.bf16.msra.mxu0 %v2476_v41 }
  0x58   :  { %2028 = vmatprep.subr.bf16.mxu0 %v2486_v48 }
  0x59   :  { %2021 = vmatpush3.bf16.msra.mxu1 %v2482_v45 }
  0x5a   :  { %2050 = vmatprep.subr.bf16.mxu1 %v2381_v5 }
  0x63   :  { %435 = vadd.xlane.f32.xlu0 %v434_v50 }
  0xb2   :  { %v93_v60 = vpop.permute.xlu0 %92 }
  0xb3   :  { %v133_v5 = vrot.slane %v93_v60, %v2495_v57  ;;  %v140_v6 = vrot.slane %v93_v60, %v2498_v58 }
  0xb5   :  { %v159_v7 = vmul.bf16 %v133_v5, %v2500_v59  ;;  %v160_v9 = vmul.bf16 %v133_v5, %v2502_v61  ;;  %v161_v10 = vmul.bf16 %v133_v5, %v2504_v62  ;;  %v162_v13 = vmul.bf16 %v140_v6, %v2506_v63  ;;  %v2522_v5 = vld [vmem:[#allocation2 + $0x38] sm:$0xff] }
  0xb6   :  { %v163_v39 = vmul.bf16 %v140_v6, %v2508_v2  ;;  %v164_v42 = vmul.bf16 %v140_v6, %v2510_v3  ;;  %v103_v49 = vpop.permute.xlu0 %102 }
  0xb7   :  { %v171_v44 = vunpack.c.l.bf16 %v159_v7  ;;  %v172_v46 = vunpack.c.h.bf16 %v159_v7  ;;  %v173_v47 = vunpack.c.l.bf16 %v160_v9  ;;  %v175_v50 = vunpack.c.l.bf16 %v161_v10 }
  0xb8   :  { %v176_v51 = vunpack.c.h.bf16 %v161_v10  ;;  %v177_v52 = vunpack.c.l.bf16 %v162_v13  ;;  %v178_v53 = vunpack.c.h.bf16 %v162_v13  ;;  %v174_v54 = vunpack.c.h.bf16 %v160_v9 }
  0xb9   :  { %v179_v55 = vunpack.c.l.bf16 %v163_v39  ;;  %v181_v56 = vunpack.c.l.bf16 %v164_v42  ;;  %v182_v60 = vunpack.c.h.bf16 %v164_v42  ;;  %v180_v1 = vunpack.c.h.bf16 %v163_v39  ;;  %v2532_v42 = vld [vmem:[#allocation2 + $0x58] sm:$0xff] }
  0xba   :  { %v195_v6 = vadd.f32 %v177_v52, %v171_v44  ;;  %v147_v7 = vrot.slane %v103_v49, %v2495_v57  ;;  %v154_v10 = vrot.slane %v103_v49, %v2498_v58  ;;  %v202_v45 = vadd.f32 %v178_v53, %v172_v46 }
  0xbb   :  { %v209_v13 = vadd.f32 %v179_v55, %v173_v47  ;;  %v223_v9 = vadd.f32 %v181_v56, %v175_v50  ;;  %v230_v43 = vadd.f32 %v182_v60, %v176_v51  ;;  %v216_v47 = vadd.f32 %v180_v1, %v174_v54 }
  0xbc   :  { %v196_v36 = vrot.slane %v195_v6, 4  ;;  %v165_v33 = vmul.bf16 %v147_v7, %v2520_v0  ;;  %v166_v39 = vmul.bf16 %v147_v7, %v2522_v5  ;;  %v167_v44 = vmul.bf16 %v147_v7, %v2524_v4 }
  0xbd   :  { %v210_v52 = vrot.slane %v209_v13, 4  ;;  %v224_v32 = vrot.slane %v223_v9, 4  ;;  %v231_v29 = vrot.slane %v230_v43, 4  ;;  %v168_v49 = vmul.bf16 %v154_v10, %v2526_v38 }
  0xbe   :  { %v197_v46 = vadd.f32 %v196_v36, %v195_v6  ;;  %v169_v50 = vmul.bf16 %v154_v10, %v2530_v37  ;;  %v170_v51 = vmul.bf16 %v154_v10, %v2532_v42  ;;  %v183_v56 = vunpack.c.l.bf16 %v165_v33 }
  0xbf   :  { %v211_v53 = vadd.f32 %v210_v52, %v209_v13  ;;  %v225_v55 = vadd.f32 %v224_v32, %v223_v9  ;;  %v184_v60 = vunpack.c.h.bf16 %v165_v33  ;;  %v185_v28 = vunpack.c.l.bf16 %v166_v39 }
  0xc0   :  { %v186_v25 = vunpack.c.h.bf16 %v166_v39  ;;  %v187_v24 = vunpack.c.l.bf16 %v167_v44  ;;  %v188_v21 = vunpack.c.h.bf16 %v167_v44  ;;  %v2540_v7 = vadd.f32 %v231_v29, %v230_v43 }
  0xc1   :  { %v189_v20 = vunpack.c.l.bf16 %v168_v49  ;;  %v190_v17 = vunpack.c.h.bf16 %v168_v49  ;;  %v191_v48 = vunpack.c.l.bf16 %v169_v50  ;;  %v192_v41 = vunpack.c.h.bf16 %v169_v50 }
  0xc2   :  { %v193_v36 = vunpack.c.l.bf16 %v170_v51  ;;  %v194_v1 = vunpack.c.h.bf16 %v170_v51  ;;  %v203_v54 = vrot.slane %v202_v45, 4  ;;  %v226_v6 = vrot.slane %v225_v55, 2 }
  0xc3   :  { %v237_v16 = vadd.f32 %v189_v20, %v183_v56  ;;  %v244_v10 = vadd.f32 %v190_v17, %v184_v60  ;;  %v251_v13 = vadd.f32 %v191_v48, %v185_v28  ;;  %v258_v32 = vadd.f32 %v192_v41, %v186_v25 }
  0xc4   :  { %v265_v9 = vadd.f32 %v193_v36, %v187_v24  ;;  %v272_v33 = vadd.f32 %v194_v1, %v188_v21  ;;  %v204_v52 = vadd.f32 %v203_v54, %v202_v45  ;;  %v217_v29 = vrot.slane %v216_v47, 4 }
  0xc5   :  { %v238_v39 = vrot.slane %v237_v16, 4  ;;  %v252_v12 = vrot.slane %v251_v13, 4  ;;  %v245_v44 = vrot.slane %v244_v10, 4  ;;  %v259_v35 = vrot.slane %v258_v32, 4 }
  0xc6   :  { %v266_v43 = vrot.slane %v265_v9, 4  ;;  %v273_v40 = vrot.slane %v272_v33, 4  ;;  %v205_v49 = vrot.slane %v204_v52, 2  ;;  %v2542_v50 = vadd.f32 %v226_v6, %v225_v55 }
  0xc7   :  { %v239_v51 = vadd.f32 %v238_v39, %v237_v16  ;;  %v246_v11 = vadd.f32 %v245_v44, %v244_v10  ;;  %v218_v34 = vadd.f32 %v217_v29, %v216_v47  ;;  %v253_v20 = vadd.f32 %v252_v12, %v251_v13 }
  0xc8   :  { %v267_v17 = vadd.f32 %v266_v43, %v265_v9  ;;  %v206_v28 = vadd.f32 %v205_v49, %v204_v52  ;;  %v260_v25 = vadd.f32 %v259_v35, %v258_v32  ;;  %v198_v41 = vrot.slane %v197_v46, 2 }
  0xc9   :  { %v247_v24 = vrot.slane %v246_v11, 2  ;;  %v219_v21 = vrot.slane %v218_v34, 2  ;;  %v240_v45 = vrot.slane %v239_v51, 2  ;;  %v274_v48 = vadd.f32 %v273_v40, %v272_v33 }
  0xca   :  { %v207_v56 = vrot.slane %v206_v28, 1  ;;  %v261_v60 = vrot.slane %v260_v25, 2  ;;  %v212_v36 = vrot.slane %v211_v53, 2  ;;  %v199_v55 = vadd.f32 %v198_v41, %v197_v46 }
  0xcb   :  { %v248_v1 = vadd.f32 %v247_v24, %v246_v11  ;;  %v220_v54 = vadd.f32 %v219_v21, %v218_v34  ;;  %v241_v6 = vadd.f32 %v240_v45, %v239_v51  ;;  %v268_v16 = vrot.slane %v267_v17, 2 }
  0xcc   :  { %v208_v10 = vadd.f32 %v207_v56, %v206_v28  ;;  %v262_v47 = vadd.f32 %v261_v60, %v260_v25  ;;  %v213_v12 = vadd.f32 %v212_v36, %v211_v53  ;;  %v200_v35 = vrot.slane %v199_v55, 1 }
  0xcd   :  { %v249_v13 = vrot.slane %v248_v1, 1  ;;  %v221_v9 = vrot.slane %v220_v54, 1  ;;  %v242_v32 = vrot.slane %v241_v6, 1  ;;  %v254_v40 = vrot.slane %v253_v20, 2 }
  0xce   :  { %v538_v52 = vpack.c.bf16 %v208_v10, %v208_v10  ;;  %v263_v39 = vrot.slane %v262_v47, 1  ;;  %v214_v44 = vrot.slane %v213_v12, 1  ;;  %v201_v43 = vadd.f32 %v200_v35, %v199_v55 }
  0xcf   :  { %v250_v33 = vadd.f32 %v249_v13, %v248_v1  ;;  %v222_v29 = vadd.f32 %v221_v9, %v220_v54  ;;  %v243_v49 = vadd.f32 %v242_v32, %v241_v6  ;;  %v269_v11 = vadd.f32 %v268_v16, %v267_v17 }
  0xd0   :  { %v264_v34 = vadd.f32 %v263_v39, %v262_v47  ;;  %v215_v46 = vadd.f32 %v214_v44, %v213_v12  ;;  %v255_v51 = vadd.f32 %v254_v40, %v253_v20  ;;  %v537_v25 = vpack.c.bf16 %v201_v43, %v201_v43 }
  0xd1   :  { %v544_v24 = vpack.c.bf16 %v250_v33, %v250_v33  ;;  %v540_v28 = vpack.c.bf16 %v222_v29, %v222_v29  ;;  %v543_v53 = vpack.c.bf16 %v243_v49, %v243_v49  ;;  %v233_v56 = vrot.slane %v2540_v7, 2  ;;  %v2551_v33 = vld [vmem:[#allocation5 + $0x148] sm:$0xff]   ;;  %v114_v29 = vpop.permute.xlu1 %113 }
  0xd2   :  { %v546_v21 = vpack.c.bf16 %v264_v34, %v264_v34  ;;  %v256_v41 = vrot.slane %v255_v51, 1  ;;  %v539_v45 = vpack.c.bf16 %v215_v46, %v215_v46  ;;  %v569_v60 = vunpack.c.l.b16 %v538_v52  ;;  %v2549_v52 = vld [vmem:[#allocation5 + $0x100] sm:$0xff]  }
  0xd3   :  { %v575_v36 = vunpack.c.l.b16 %v544_v24  ;;  %v568_v10 = vunpack.c.l.b16 %v537_v25  ;;  %v574_v1 = vunpack.c.l.b16 %v543_v53  ;;  %v571_v54 = vunpack.c.l.b16 %v540_v28 }
  0xd4   :  { %v577_v55 = vunpack.c.l.b16 %v546_v21  ;;  %v257_v6 = vadd.f32 %v256_v41, %v255_v51  ;;  %v234_v17 = vadd.f32 %v233_v56, %v2540_v7  ;;  %v570_v47 = vunpack.c.l.b16 %v539_v45  ;;  %v2562_v56 = vld [vmem:[#allocation5 + $0x150] sm:$0xff]  }
  0xd5   :  { %v582_v20 = vsel %vm580_vm1, %v575_v36, %v569_v60  ;;  %v581_v16 = vsel %vm580_vm1, %v574_v1, %v568_v10  ;;  %v275_v12 = vrot.slane %v274_v48, 2  ;;  %v228_v7 = vrot.slane %v2542_v50, 1 }
  0xd6   :  { %v588_v13 = vpack.c.b16 %v582_v20, %v582_v20  ;;  %v584_v9 = vsel %vm580_vm1, %v577_v55, %v571_v54  ;;  %v587_v35 = vpack.c.b16 %v581_v16, %v581_v16  ;;  %v545_v32 = vpack.c.bf16 %v257_v6, %v257_v6  ;;  %v2574_v16 = vld [vmem:[#allocation5 + $0x158] sm:$0xff]  }
  0xd7   :  { %v590_v39 = vpack.c.b16 %v584_v9, %v584_v9  ;;  %v235_v44 = vrot.slane %v234_v17, 1  ;;  %v276_v40 = vadd.f32 %v275_v12, %v274_v48  ;;  %v270_v49 = vrot.slane %v269_v11, 1  ;;  %v2558_v48 = vld [vmem:[#allocation5 + $0x108] sm:$0xff]  }
  0xd8   :  { %919 = vmatprep.mubr.bf16.mxu0 %v588_v13  ;;  %v576_v43 = vunpack.c.l.b16 %v545_v32  ;;  %v287_v34 = vrot.slane %v114_v29, %v2495_v57  ;;  %v294_v46 = vrot.slane %v114_v29, %v2498_v58  ;;  %v229_v60 = vadd.f32 %v228_v7, %v2542_v50  ;;  %v124_v50 = vpop.permute.xlu1 %123 }
  0xd9   :  { %959 = vmatprep.mubr.bf16.mxu1 %v590_v39  ;;  %920 = vmatmul.mubr.bf16.vlgmr.msra.gmra.mrb[0].mxu0 %v587_v35  ;;  %v236_v51 = vadd.f32 %v235_v44, %v234_v17  ;;  %v277_v24 = vrot.slane %v276_v40, 1  ;;  %v271_v25 = vadd.f32 %v270_v49, %v269_v11  ;;  %v2568_v11 = vld [vmem:[#allocation5 + $0x110] sm:$0xff]   ;;  %v301_v9 = vrot.slane %v124_v50, %v2495_v57  ;;  %v2581_v35 = vld [vmem:[#allocation5 + $0x118] sm:$0xff]  }
  0xda   :  { %v583_v28 = vsel %vm580_vm1, %v576_v43, %v570_v47  ;;  %2029 = vmatpush3.bf16.msra.mxu0 %v2549_v52  ;;  %v313_v53 = vmul.bf16 %v287_v34, %v2500_v59  ;;  %v316_v36 = vmul.bf16 %v294_v46, %v2506_v63  ;;  %v314_v54 = vmul.bf16 %v287_v34, %v2502_v61 }
  0xdb   :  { %v589_v21 = vpack.c.b16 %v583_v28, %v583_v28  ;;  %v278_v41 = vadd.f32 %v277_v24, %v276_v40  ;;  %v542_v45 = vpack.c.bf16 %v236_v51, %v236_v51  ;;  %2030 = vmatprep.subr.bf16.mxu0 %v2551_v33  ;;  %v547_v1 = vpack.c.bf16 %v271_v25, %v271_v25  ;;  %v2591_v25 = vld [vmem:[#allocation5 + $0x120] sm:$0xff]  }
  0xdc   :  { %v315_v59 = vmul.bf16 %v287_v34, %v2504_v62  ;;  %v317_v55 = vmul.bf16 %v294_v46, %v2508_v2  ;;  %v325_v6 = vunpack.c.l.bf16 %v313_v53  ;;  %v326_v17 = vunpack.c.h.bf16 %v313_v53 }
  0xdd   :  { %960 = vmatmul.mubr.bf16.vlgmr.msra.gmra.mrb[0].mxu1 %v589_v21  ;;  %v548_v10 = vpack.c.bf16 %v278_v41, %v278_v41  ;;  %v573_v20 = vunpack.c.l.b16 %v542_v45  ;;  %v318_v61 = vmul.bf16 %v294_v46, %v2510_v3  ;;  %v331_v47 = vunpack.c.l.bf16 %v316_v36  ;;  %v2584_v3 = vld [vmem:[#allocation5 + $0x160] sm:$0xff]   ;;  %v2595_v41 = vld [vmem:[#allocation5 + $0x168] sm:$0xff]  }
  0xde   :  { %2031 = vmatpush3.bf16.msra.mxu0 %v2558_v48  ;;  %2051 = vmatpush3.bf16.msra.mxu1 %v2384_v8  ;;  %v541_v12 = vpack.c.bf16 %v229_v60, %v229_v60  ;;  %v332_v62 = vunpack.c.h.bf16 %v316_v36  ;;  %v328_v13 = vunpack.c.h.bf16 %v314_v54  ;;  %v334_v32 = vunpack.c.h.bf16 %v317_v55 }
  0xdf   :  { %v579_v63 = vunpack.c.l.b16 %v548_v10  ;;  %2032 = vmatprep.subr.bf16.mxu0 %v2562_v56  ;;  %2052 = vmatprep.subr.bf16.mxu1 %v2394_v14  ;;  %v349_v39 = vadd.f32 %v331_v47, %v325_v6  ;;  %v578_v14 = vunpack.c.l.b16 %v547_v1  ;;  %v330_v40 = vunpack.c.h.bf16 %v315_v59 }
  0xe0   :  { %v356_v44 = vadd.f32 %v332_v62, %v326_v17  ;;  %v336_v7 = vunpack.c.h.bf16 %v318_v61  ;;  %v308_v29 = vrot.slane %v124_v50, %v2498_v58  ;;  %v572_v43 = vunpack.c.l.b16 %v541_v12 }
  0xe1   :  { %v586_v2 = vsel %vm580_vm1, %v579_v63, %v573_v20  ;;  %v327_v57 = vunpack.c.l.bf16 %v314_v54  ;;  %v333_v49 = vunpack.c.l.bf16 %v317_v55  ;;  %v350_v34 = vrot.slane %v349_v39, 4 }
  0xe2   :  { %v592_v8 = vpack.c.b16 %v586_v2, %v586_v2  ;;  %2033 = vmatpush3.bf16.msra.mxu0 %v2568_v11  ;;  %2053 = vmatpush3.bf16.msra.mxu1 %v2398_v15  ;;  %v329_v46 = vunpack.c.l.bf16 %v315_v59  ;;  %v335_v51 = vunpack.c.l.bf16 %v318_v61  ;;  %v357_v24 = vrot.slane %v356_v44, 4 }
  0xe3   :  { %2034 = vmatprep.subr.bf16.mxu0 %v2574_v16  ;;  %v319_v28 = vmul.bf16 %v301_v9, %v2520_v0  ;;  %2054 = vmatprep.subr.bf16.mxu1 %v2406_v18  ;;  %v351_v53 = vadd.f32 %v350_v34, %v349_v39  ;;  %v370_v58 = vadd.f32 %v334_v32, %v328_v13 }
  0xe4   :  { %999 = vmatprep.mubr.bf16.mxu0 %v592_v8  ;;  %v320_v21 = vmul.bf16 %v301_v9, %v2522_v5  ;;  %v2598_v15 = vsel %vm580_vm1, %v578_v14, %v572_v43  ;;  %v384_v45 = vadd.f32 %v336_v7, %v330_v40  ;;  %v2601_v0 = vmul.bf16 %v301_v9, %v2524_v4  ;;  %v2613_v4 = vld [vmem:[#allocation5 + $0x128] sm:$0xff]   ;;  %v2623_v8 = vld [vmem:[#allocation5 + $0x130] sm:$0xff]   ;;  %v2626_v40 = vld [vmem:[#allocation5 + $0x178] sm:$0xff]  }
  0xe5   :  { %v322_v18 = vmul.bf16 %v308_v29, %v2526_v38  ;;  %v352_v60 = vrot.slane %v351_v53, 2  ;;  %v363_v36 = vadd.f32 %v333_v49, %v327_v57  ;;  %v323_v10 = vmul.bf16 %v308_v29, %v2530_v37 }
  0xe6   :  { %2035 = vmatpush3.bf16.msra.mxu0 %v2581_v35  ;;  %v2606_v1 = vmul.bf16 %v308_v29, %v2532_v42  ;;  %2055 = vmatpush3.bf16.msra.mxu1 %v2409_v19  ;;  %v358_v5 = vadd.f32 %v357_v24, %v356_v44  ;;  %v2609_v54 = vadd.f32 %v335_v51, %v329_v46  ;;  %v337_v59 = vunpack.c.l.bf16 %v319_v28  ;;  %v2616_v42 = vld [vmem:[#allocation5 + $0x170] sm:$0xff]  }
  0xe7   :  { %2036 = vmatprep.subr.bf16.mxu0 %v2584_v3  ;;  %v338_v55 = vunpack.c.h.bf16 %v319_v28  ;;  %2056 = vmatprep.subr.bf16.mxu1 %v2418_v22  ;;  %v353_v38 = vadd.f32 %v352_v60, %v351_v53  ;;  %v371_v6 = vrot.slane %v370_v58, 4  ;;  %v339_v17 = vunpack.c.l.bf16 %v320_v21  ;;  %v2633_v53 = vld [vmem:[#allocation5 + $0x138] sm:$0xff]  }
  0xe8   :  { %v340_v37 = vunpack.c.h.bf16 %v320_v21  ;;  %v385_v19 = vrot.slane %v384_v45, 4  ;;  %v342_v50 = vunpack.c.h.bf16 %v2601_v0  ;;  %v343_v20 = vunpack.c.l.bf16 %v322_v18 }
  0xe9   :  { %v344_v63 = vunpack.c.h.bf16 %v322_v18  ;;  %v364_v61 = vrot.slane %v363_v36, 4  ;;  %v345_v47 = vunpack.c.l.bf16 %v323_v10  ;;  %v346_v22 = vunpack.c.h.bf16 %v323_v10 }
  0xea   :  { %2037 = vmatpush3.bf16.msra.mxu0 %v2591_v25  ;;  %v348_v12 = vunpack.c.h.bf16 %v2606_v1  ;;  %2057 = vmatpush3.bf16.msra.mxu1 %v2421_v23  ;;  %v391_v62 = vadd.f32 %v343_v20, %v337_v59  ;;  %v359_v13 = vrot.slane %v358_v5, 2  ;;  %v354_v9 = vrot.slane %v353_v38, 1 }
  0xeb   :  { %2038 = vmatprep.subr.bf16.mxu0 %v2595_v41  ;;  %v398_v2 = vadd.f32 %v344_v63, %v338_v55  ;;  %2058 = vmatprep.subr.bf16.mxu1 %v2430_v26  ;;  %v372_v32 = vadd.f32 %v371_v6, %v370_v58  ;;  %v405_v39 = vadd.f32 %v345_v47, %v339_v17  ;;  %v341_v26 = vunpack.c.l.bf16 %v2601_v0 }
  0xec   :  { %v412_v44 = vadd.f32 %v346_v22, %v340_v37  ;;  %v426_v14 = vadd.f32 %v348_v12, %v342_v50  ;;  %v386_v7 = vadd.f32 %v385_v19, %v384_v45  ;;  %v392_v23 = vrot.slane %v391_v62, 4  ;;  %v2789_v12 = vld [vmem:[#allocation27_spill] sm:$0xff] }
  0xed   :  { %v399_v29 = vrot.slane %v398_v2, 4  ;;  %v360_v43 = vadd.f32 %v359_v13, %v358_v5  ;;  %v347_v57 = vunpack.c.l.bf16 %v2606_v1  ;;  %v355_v28 = vadd.f32 %v354_v9, %v353_v38  ;;  %v2787_v38 = vld [vmem:[#allocation26_spill] sm:$0xff]  ;;  %v2790_v9 = vld [vmem:[#allocation31_spill] sm:$0xff] }
  0xee   :  { %2039 = vmatpush3.bf16.msra.mxu0 %v2613_v4  ;;  %v413_v49 = vrot.slane %v412_v44, 4  ;;  %v427_v34 = vrot.slane %v426_v14, 4  ;;  %2059 = vmatpush3.bf16.msra.mxu1 %v2433_v27  ;;  %v393_v46 = vadd.f32 %v392_v23, %v391_v62  ;;  %v591_v58 = vpack.c.b16 %v2598_v15, %v2598_v15 }
  0xef   :  { %2040 = vmatprep.subr.bf16.mxu0 %v2616_v42  ;;  %v400_v51 = vadd.f32 %v399_v29, %v398_v2  ;;  %2060 = vmatprep.subr.bf16.mxu1 %v2442_v30  ;;  %v361_v24 = vrot.slane %v360_v43, 1  ;;  %v365_v21 = vadd.f32 %v364_v61, %v363_v36  ;;  %v406_v45 = vrot.slane %v405_v39, 4  ;;  %v2788_v61 = vld [vmem:[#allocation14_spill] sm:$0xff]  ;;  %v2791_v29 = vld [vmem:[#allocation15_spill] sm:$0xff] }
  0xf0   :  { %v414_v0 = vadd.f32 %v413_v49, %v412_v44  ;;  %v378_v27 = vrot.slane %v2609_v54, 4  ;;  %v394_v18 = vrot.slane %v393_v46, 2  ;;  %v419_v30 = vadd.f32 %v347_v57, %v341_v26 }
  0xf1   :  { %v362_v60 = vadd.f32 %v361_v24, %v360_v43  ;;  %v401_v10 = vrot.slane %v400_v51, 2  ;;  %v428_v1 = vadd.f32 %v427_v34, %v426_v14  ;;  %v373_v5 = vrot.slane %v372_v32, 2 }
  0xf2   :  { %2041 = vmatpush3.bf16.msra.mxu0 %v2623_v8  ;;  %2061 = vmatpush3.bf16.msra.mxu1 %v2445_v31  ;;  %v415_v59 = vrot.slane %v414_v0, 2  ;;  %v395_v55 = vadd.f32 %v394_v18, %v393_v46  ;;  %v1007_v36 = vpack.c.bf16 %v355_v28, %v355_v28  ;;  %v387_v6 = vrot.slane %v386_v7, 2  ;;  %v2792_v46 = vld [vmem:[#allocation16_spill] sm:$0xff] }
  0xf3   :  { %2042 = vmatprep.subr.bf16.mxu0 %v2626_v40  ;;  %2062 = vmatprep.subr.bf16.mxu1 %v2787_v38  ;;  %v402_v15 = vadd.f32 %v401_v10, %v400_v51  ;;  %v366_v17 = vrot.slane %v365_v21, 2  ;;  %v407_v37 = vadd.f32 %v406_v45, %v405_v39  ;;  %v374_v19 = vadd.f32 %v373_v5, %v372_v32  ;;  %v2793_v28 = vld [vmem:[#allocation32_spill] sm:$0xff]  ;;  %v2794_v10 = vld [vmem:[#allocation35_spill] sm:$0xff] }
  0xf4   :  { %v416_v50 = vadd.f32 %v415_v59, %v414_v0  ;;  %v1008_v63 = vpack.c.bf16 %v362_v60, %v362_v60  ;;  %v396_v47 = vrot.slane %v395_v55, 1  ;;  %v388_v31 = vadd.f32 %v387_v6, %v386_v7 }
  0xf5   :  { %v403_v20 = vrot.slane %v402_v15, 1  ;;  %v420_v22 = vrot.slane %v419_v30, 4  ;;  %v375_v62 = vrot.slane %v374_v19, 1  ;;  %v429_v13 = vrot.slane %v428_v1, 2 }
  0xf6   :  { %2043 = vmatpush3.bf16.msra.mxu0 %v2633_v53  ;;  %2063 = vmatpush3.bf16.msra.mxu1 %v2789_v12  ;;  %v417_v2 = vrot.slane %v416_v50, 1  ;;  %v397_v14 = vadd.f32 %v396_v47, %v395_v55  ;;  %v1032_v39 = vunpack.c.l.b16 %v1007_v36  ;;  %v389_v32 = vrot.slane %v388_v31, 1  ;;  %v2795_v55 = vld [vmem:[#allocation17_spill] sm:$0xff] }
  0xf7   :  { %2072 = vmatprep.subr.bf16.mxu0 %v2788_v61  ;;  %2064 = vmatprep.subr.bf16.mxu1 %v2790_v9  ;;  %v404_v44 = vadd.f32 %v403_v20, %v402_v15  ;;  %v408_v23 = vrot.slane %v407_v37, 2  ;;  %v376_v43 = vadd.f32 %v375_v62, %v374_v19  ;;  %v430_v57 = vadd.f32 %v429_v13, %v428_v1  ;;  %v2796_v19 = vld [vmem:[#allocation18_spill] sm:$0xff]  ;;  %v2799_v9 = vld [vmem:[#allocation21_spill] sm:$0xff] }
  0xf8   :  { %v418_v26 = vadd.f32 %v417_v2, %v416_v50  ;;  %v1033_v49 = vunpack.c.l.b16 %v1008_v63  ;;  %v1013_v34 = vpack.c.bf16 %v397_v14, %v397_v14  ;;  %v390_v51 = vadd.f32 %v389_v32, %v388_v31 }
  0xf9   :  { %1000 = vmatmul.mubr.bf16.vlgmr.msra.gmra.mrb[4].mxu0 %v591_v58  ;;  %v1014_v7 = vpack.c.bf16 %v404_v44, %v404_v44  ;;  %v379_v24 = vadd.f32 %v378_v27, %v2609_v54  ;;  %v1010_v58 = vpack.c.bf16 %v376_v43, %v376_v43  ;;  %v431_v0 = vrot.slane %v430_v57, 1 }
  0xfa   :  { %2073 = vmatpush3.bf16.msra.mxu0 %v2791_v29  ;;  %2065 = vmatpush3.bf16.msra.mxu1 %v2793_v28  ;;  %v1016_v45 = vpack.c.bf16 %v418_v26, %v418_v26  ;;  %v367_v18 = vadd.f32 %v366_v17, %v365_v21  ;;  %v1038_v5 = vunpack.c.l.b16 %v1013_v34  ;;  %v1012_v59 = vpack.c.bf16 %v390_v51, %v390_v51  ;;  %v2802_v26 = vld [vmem:[#allocation24_spill] sm:$0xff]  ;;  %v2805_v51 = vld [vmem:[#allocation29_spill] sm:$0xff] }
  0xfb   :  { %2074 = vmatprep.subr.bf16.mxu0 %v2792_v46  ;;  %v1039_v60 = vunpack.c.l.b16 %v1014_v7  ;;  %2094 = vmatprep.subr.bf16.mxu1 %v2794_v10  ;;  %v409_v1 = vadd.f32 %v408_v23, %v407_v37  ;;  %v1035_v38 = vunpack.c.l.b16 %v1010_v58  ;;  %v432_v36 = vadd.f32 %v431_v0, %v430_v57  ;;  %v2797_v37 = vld [vmem:[#allocation19_spill] sm:$0xff]  ;;  %v2803_v7 = vld [vmem:[#allocation25_spill] sm:$0xff]  ;;  %v2804_v46 = vld [vmem:[#allocation28_spill] sm:$0xff] }
  0xfc   :  { %v1041_v15 = vunpack.c.l.b16 %v1016_v45  ;;  %v421_v6 = vadd.f32 %v420_v22, %v419_v30  ;;  %v1044_v27 = vsel %vm580_vm1, %v1038_v5, %v1032_v39  ;;  %v1037_v50 = vunpack.c.l.b16 %v1012_v59  ;;  %v2798_v30 = vld [vmem:[#allocation20_spill] sm:$0xff]  ;;  %v2800_v39 = vld [vmem:[#allocation22_spill] sm:$0xff] }
  0xfd   :  { %v1045_v54 = vsel %vm580_vm1, %v1039_v60, %v1033_v49  ;;  %v1050_v17 = vpack.c.b16 %v1044_v27, %v1044_v27  ;;  %v1018_v63 = vpack.c.bf16 %v432_v36, %v432_v36  ;;  %v368_v31 = vrot.slane %v367_v18, 1  ;;  %v2807_v45 = vld [vmem:[#allocation34_spill] sm:$0xff]  ;;  %v1184_v60 = vld [vmem:[#allocation7 + $0x8] sm:$0xff] }
  0xfe   :  { %2075 = vmatpush3.bf16.msra.mxu0 %v2795_v55  ;;  %v1051_v21 = vpack.c.b16 %v1045_v54, %v1045_v54  ;;  %v1047_v20 = vsel %vm580_vm1, %v1041_v15, %v1035_v38  ;;  %v410_v12 = vrot.slane %v409_v1, 1  ;;  %v380_v22 = vrot.slane %v379_v24, 2  ;;  %v2808_v10 = vld [vmem:[#allocation30_spill] sm:$0xff]  ;;  %v1195_v55 = vld [vmem:[#allocation7 + $0x60] sm:$0xff]  ;;  %v1196_v36 = vld [vmem:[#allocation7 + $0x68] sm:$0xff] }
  0xff   :  { %2076 = vmatprep.subr.bf16.mxu0 %v2796_v19  ;;  %v1053_v61 = vpack.c.b16 %v1047_v20, %v1047_v20  ;;  %v1043_v47 = vunpack.c.l.b16 %v1018_v63  ;;  %v422_v62 = vrot.slane %v421_v6, 2  ;;  %v369_v44 = vadd.f32 %v368_v31, %v367_v18  ;;  %v1187_v18 = vld [vmem:[#allocation7 + $0x20] sm:$0xff]  ;;  %v1200_v27 = vld [vmem:[#allocation7 + $0x88] sm:$0xff] }
 0x100   :  { %1094 = vmatprep.mubr.bf16.mxu1 %v1051_v21  ;;  %v411_v14 = vadd.f32 %v410_v12, %v409_v1  ;;  %v381_v32 = vadd.f32 %v380_v22, %v379_v24  ;;  %v2806_v24 = vld [vmem:[#allocation33_spill] sm:$0xff]  ;;  %v1191_v1 = vld [vmem:[#allocation7 + $0x40] sm:$0xff] }
 0x101   :  { %1095 = vmatmul.mubr.bf16.vlgmr.msra.gmra.mrb[4].mxu1 %v1050_v17  ;;  %1134 = vmatprep.mubr.bf16.mxu0 %v1053_v61  ;;  %v1049_v2 = vsel %vm580_vm1, %v1043_v47, %v1037_v50  ;;  %v423_v23 = vadd.f32 %v422_v62, %v421_v6  ;;  %v1009_v29 = vpack.c.bf16 %v369_v44, %v369_v44  ;;  %v1199_v6 = vld [vmem:[#allocation7 + $0x80] sm:$0xff]  ;;  %v1204_v19 = vld [vmem:[#allocation7 + $0xa8] sm:$0xff] }
 0x102   :  { %2077 = vmatpush3.bf16.msra.mxu0 %v2797_v37  ;;  %2095 = vmatpush3.bf16.msra.mxu1 %v2549_v52  ;;  %v1055_v13 = vpack.c.b16 %v1049_v2, %v1049_v2  ;;  %v2801_v52 = vld [vmem:[#allocation23_spill] sm:$0xff]  ;;  %v1015_v43 = vpack.c.bf16 %v411_v14, %v411_v14  ;;  %v1928_v15 = vcombine.high %v1191_v1, %v1195_v55  ;;  %v1208_v37 = vld [vmem:[#allocation7 + $0xc8] sm:$0xff] }
 0x103   :  { %2078 = vmatprep.subr.bf16.mxu0 %v2798_v30  ;;  %2096 = vmatprep.subr.bf16.mxu1 %v2551_v33  ;;  %v382_v33 = vrot.slane %v381_v32, 1  ;;  %v424_v57 = vrot.slane %v423_v23, 1  ;;  %v1034_v49 = vunpack.c.l.b16 %v1009_v29  ;;  %v1203_v54 = vld [vmem:[#allocation7 + $0xa0] sm:$0xff]  ;;  %v1927_v50 = vcombine.low %v1191_v1, %v1195_v55  ;;  %v1212_v47 = vld [vmem:[#allocation7 + $0xe8] sm:$0xff]  ;;  %v1190_v1 = vld [vmem:[#allocation7 + $0x38] sm:$0xff] }
 0x104   :  { %1174 = vmatprep.mubr.bf16.mxu1 %v1055_v13  ;;  %v1040_v34 = vunpack.c.l.b16 %v1015_v43  ;;  %v1936_v17 = vcombine.high %v1199_v6, %v1203_v54  ;;  %v1938_v20 = vcombine.high %v1200_v27, %v1204_v19  ;;  %v1207_v63 = vld [vmem:[#allocation7 + $0xc0] sm:$0xff]  ;;  %v1935_v31 = vcombine.low %v1199_v6, %v1203_v54  ;;  %v1216_v13 = vld [vmem:[#allocation7 + $0x108] sm:$0xff] }
 0x105   :  { %v1211_v61 = vld [vmem:[#allocation7 + $0xe0] sm:$0xff]  ;;  %v1937_v12 = vcombine.low %v1200_v27, %v1204_v19  ;;  %v1946_v22 = vcombine.high %v1208_v37, %v1212_v47  ;;  %v1945_v14 = vcombine.low %v1208_v37, %v1212_v47  ;;  %v1224_v29 = vld [vmem:[#allocation7 + $0x148] sm:$0xff] }
 0x106   :  { %2079 = vmatpush3.bf16.msra.mxu0 %v2799_v9  ;;  %2097 = vmatpush3.bf16.msra.mxu1 %v2558_v48  ;;  %v383_v48 = vadd.f32 %v382_v33, %v381_v32  ;;  %v1944_v30 = vcombine.high %v1207_v63, %v1211_v61  ;;  %v1215_v62 = vld [vmem:[#allocation7 + $0x100] sm:$0xff]  ;;  %v1220_v9 = vld [vmem:[#allocation7 + $0x128] sm:$0xff]  ;;  %v1943_v44 = vcombine.low %v1207_v63, %v1211_v61 }
 0x107   :  { %2080 = vmatprep.subr.bf16.mxu0 %v2800_v39  ;;  %2098 = vmatprep.subr.bf16.mxu1 %v2562_v56  ;;  %v425_v56 = vadd.f32 %v424_v57, %v423_v23  ;;  %v1219_v2 = vld [vmem:[#allocation7 + $0x120] sm:$0xff]  ;;  %v1954_v32 = vcombine.high %v1216_v13, %v1220_v9  ;;  %v1228_v43 = vld [vmem:[#allocation7 + $0x168] sm:$0xff]  ;;  %v1953_v33 = vcombine.low %v1216_v13, %v1220_v9  ;;  %v1198_v13 = vld [vmem:[#allocation7 + $0x78] sm:$0xff] }
 0x108   :  { %v1952_v39 = vcombine.high %v1215_v62, %v1219_v2  ;;  %v1223_v23 = vld [vmem:[#allocation7 + $0x140] sm:$0xff] }
 0x109   :  { %v1017_v28 = vpack.c.bf16 %v425_v56, %v425_v56 }
 0x10a   :  { %2081 = vmatpush3.bf16.msra.mxu0 %v2801_v52  ;;  %2099 = vmatpush3.bf16.msra.mxu1 %v2568_v11  ;;  %v1046_v11 = vsel %vm580_vm1, %v1040_v34, %v1034_v49  ;;  %v1227_v52 = vld [vmem:[#allocation7 + $0x160] sm:$0xff] }
 0x10b   :  { %2082 = vmatprep.subr.bf16.mxu0 %v2802_v26  ;;  %2100 = vmatprep.subr.bf16.mxu1 %v2574_v16  ;;  %v1011_v16 = vpack.c.bf16 %v383_v48, %v383_v48  ;;  %v1052_v58 = vpack.c.b16 %v1046_v11, %v1046_v11  ;;  %v1042_v0 = vunpack.c.l.b16 %v1017_v28  ;;  %v1951_v26 = vcombine.low %v1215_v62, %v1219_v2  ;;  %v1231_v49 = vld [vmem:[#allocation7 + $0x180] sm:$0xff]  ;;  %v1236_v48 = vld [vmem:[#allocation7 + $0x1a8] sm:$0xff]  ;;  %v1197_v62 = vld [vmem:[#allocation7 + $0x70] sm:$0xff] }
 0x10c   :  { %v1960_v57 = vcombine.high %v1223_v23, %v1227_v52  ;;  %v1235_v34 = vld [vmem:[#allocation7 + $0x1a0] sm:$0xff]  ;;  %v1959_v56 = vcombine.low %v1223_v23, %v1227_v52  ;;  %v1194_v2 = vld [vmem:[#allocation7 + $0x58] sm:$0xff]  ;;  %v1205_v23 = vld [vmem:[#allocation7 + $0xb0] sm:$0xff] }
 0x10d   :  { %v1968_v11 = vcombine.high %v1231_v49, %v1235_v34  ;;  %v1202_v52 = vld [vmem:[#allocation7 + $0x98] sm:$0xff] }
 0x10e   :  { %2083 = vmatpush3.bf16.msra.mxu0 %v2803_v7  ;;  %2101 = vmatpush3.bf16.msra.mxu1 %v2581_v35  ;;  %v1036_v35 = vunpack.c.l.b16 %v1011_v16  ;;  %v1962_v7 = vcombine.high %v1224_v29, %v1228_v43  ;;  %v1967_v16 = vcombine.low %v1231_v49, %v1235_v34  ;;  %v1213_v34 = vld [vmem:[#allocation7 + $0xf0] sm:$0xff] }
 0x10f   :  { %2084 = vmatprep.subr.bf16.mxu0 %v2804_v46  ;;  %2102 = vmatprep.subr.bf16.mxu1 %v2584_v3  ;;  %v1232_v46 = vld [vmem:[#allocation7 + $0x188] sm:$0xff] }
 0x110   :  { %v1048_v3 = vsel %vm580_vm1, %v1042_v0, %v1036_v35  ;;  %v1969_v28 = vcombine.low %v1232_v46, %v1236_v48  ;;  %v1240_v35 = vld [vmem:[#allocation7 + $0x1c8] sm:$0xff] }
 0x112   :  { %2085 = vmatpush3.bf16.msra.mxu0 %v2805_v51  ;;  %2103 = vmatpush3.bf16.msra.mxu1 %v2591_v25  ;;  %v1054_v25 = vpack.c.b16 %v1048_v3, %v1048_v3  ;;  %v1961_v51 = vcombine.low %v1224_v29, %v1228_v43  ;;  %v1206_v29 = vld [vmem:[#allocation7 + $0xb8] sm:$0xff] }
 0x113   :  { %2086 = vmatprep.subr.bf16.mxu0 %v2806_v24  ;;  %2104 = vmatprep.subr.bf16.mxu1 %v2595_v41  ;;  %v1183_v41 = vld [vmem:[#allocation7] sm:$0xff]  ;;  %v1970_v24 = vcombine.high %v1232_v46, %v1236_v48  ;;  %v1210_v46 = vld [vmem:[#allocation7 + $0xd8] sm:$0xff] }
 0x114   :  { %v1919_v5 = vcombine.low %v1183_v41, %v1187_v18  ;;  %v1920_v59 = vcombine.high %v1183_v41, %v1187_v18  ;;  %v2287_v41 = vmov 0   ;;  %v1185_v18 = vld [vmem:[#allocation7 + $0x10] sm:$0xff]  ;;  %v1214_v48 = vld [vmem:[#allocation7 + $0xf8] sm:$0xff] }
 0x115   :  { %2132 = vset.pattern.permute.xlu0 %v2287_v41  ;;  %2133 = vset.pattern.permute.xlu1 %v2287_v41 }
 0x116   :  { %2087 = vmatpush3.bf16.msra.mxu0 %v2807_v45  ;;  %2105 = vmatpush3.bf16.msra.mxu1 %v2613_v4  ;;  %v437_v4 = vsel %vm433_vm0, %v2808_v10, 0.0  ;;  %v1243_v45 = vld [vmem:[#allocation7 + $0x1e0] sm:$0xff] }
 0x117   :  { %2106 = vmatprep.subr.bf16.mxu1 %v2616_v42  ;;  %v1188_v42 = vld [vmem:[#allocation7 + $0x28] sm:$0xff]  ;;  %438 = vadd.xlane.f32.xlu1 %v437_v4 }
 0x118   :  { %v1922_v38 = vcombine.high %v1184_v60, %v1188_v42  ;;  %1567 = vmatprep.subr.bf16.mxu0 %v1920_v59 }
 0x119   :  { %1135 = vmatmul.mubr.bf16.vlgmr.msra.gmra.mrb[8].mxu0 %v1052_v58  ;;  %v1239_v58 = vld [vmem:[#allocation7 + $0x1c0] sm:$0xff] }
 0x11a   :  { %2107 = vmatpush3.bf16.msra.mxu1 %v2623_v8  ;;  %v1921_v8 = vcombine.low %v1184_v60, %v1188_v42  ;;  %1568 = vmatpush1.bf16.msra.mxu0 %v1919_v5  ;;  %v1975_v0 = vcombine.low %v1239_v58, %v1243_v45  ;;  %v1976_v3 = vcombine.high %v1239_v58, %v1243_v45  ;;  %v1189_v60 = vld [vmem:[#allocation7 + $0x30] sm:$0xff]  ;;  %v1186_v42 = vld [vmem:[#allocation7 + $0x18] sm:$0xff] }
 0x11b   :  { %2108 = vmatprep.subr.bf16.mxu1 %v2626_v40  ;;  %v1192_v40 = vld [vmem:[#allocation7 + $0x48] sm:$0xff]  ;;  %1569 = vmatprep.subr.bf16.mxu0 %v1928_v15  ;;  %v1923_v5 = vcombine.low %v1185_v18, %v1189_v60  ;;  %v1924_v59 = vcombine.high %v1185_v18, %v1189_v60  ;;  %v1925_v55 = vcombine.low %v1186_v42, %v1190_v1  ;;  %v436_v15 = vpop.xlane.xlu0 %435 }
 0x11c   :  { %v1929_v21 = vcombine.low %v1192_v40, %v1196_v36  ;;  %1599 = vmatprep.mubr.bf16.mxu0 %v2287_v41  ;;  %v1950_v45 = vcombine.high %v1210_v46, %v1214_v48 }
 0x11e   :  { %2109 = vmatpush3.bf16.msra.mxu1 %v2633_v53  ;;  %v1930_v53 = vcombine.high %v1192_v40, %v1196_v36  ;;  %1570 = vmatpush1.bf16.msra.mxu0 %v1927_v50 }
 0x11f   :  { %1608 = vmatprep.subr.bf16.mxu1 %v1922_v38  ;;  %1571 = vmatprep.subr.bf16.mxu0 %v1936_v17  ;;  %v2693_v38 = vld [vmem:[%s2732_s4] ss:$0 sm:$0xff] }
 0x120   :  { %v555_v36 = vmul.f32 %v2693_v38, %v436_v15 }
 0x121   :  { %1175 = vmatmul.mubr.bf16.vlgmr.msra.gmra.mrb[8].mxu1 %v1054_v25  ;;  %v1244_v25 = vld [vmem:[#allocation7 + $0x1e8] sm:$0xff] }
 0x122   :  { %1609 = vmatpush1.bf16.msra.mxu1 %v1921_v8  ;;  %1572 = vmatpush1.bf16.msra.mxu0 %v1935_v31  ;;  %v1977_v10 = vcombine.low %v1240_v35, %v1244_v25  ;;  %v1978_v4 = vcombine.high %v1240_v35, %v1244_v25  ;;  %v1926_v8 = vcombine.high %v1186_v42, %v1190_v1  ;;  %v1217_v35 = vld [vmem:[#allocation7 + $0x110] sm:$0xff]  ;;  %v1222_v25 = vld [vmem:[#allocation7 + $0x138] sm:$0xff] }
 0x123   :  { %1610 = vmatprep.subr.bf16.mxu1 %v1930_v53  ;;  %1573 = vmatprep.subr.bf16.mxu0 %v1944_v30  ;;  %v1193_v30 = vld [vmem:[#allocation7 + $0x50] sm:$0xff]  ;;  %v1230_v42 = vld [vmem:[#allocation7 + $0x178] sm:$0xff] }
 0x124   :  { %1640 = vmatprep.mubr.bf16.mxu1 %v2287_v41  ;;  %v1931_v43 = vcombine.low %v1193_v30, %v1197_v62 }
 0x126   :  { %1611 = vmatpush1.bf16.msra.mxu1 %v1929_v21  ;;  %1574 = vmatpush1.bf16.msra.mxu0 %v1943_v44 }
 0x127   :  { %1612 = vmatprep.subr.bf16.mxu1 %v1938_v20  ;;  %1575 = vmatprep.subr.bf16.mxu0 %v1952_v39  ;;  %v1934_v39 = vcombine.high %v1194_v2, %v1198_v13 }
 0x12a   :  { %1613 = vmatpush1.bf16.msra.mxu1 %v1937_v12  ;;  %1576 = vmatpush1.bf16.msra.mxu0 %v1951_v26  ;;  %v1933_v26 = vcombine.low %v1194_v2, %v1198_v13 }
 0x12b   :  { %1614 = vmatprep.subr.bf16.mxu1 %v1946_v22  ;;  %1577 = vmatprep.subr.bf16.mxu0 %v1960_v57  ;;  %v1942_v57 = vcombine.high %v1202_v52, %v1206_v29 }
 0x12e   :  { %1615 = vmatpush1.bf16.msra.mxu1 %v1945_v14  ;;  %1578 = vmatpush1.bf16.msra.mxu0 %v1959_v56  ;;  %v1932_v14 = vcombine.high %v1193_v30, %v1197_v62 }
 0x12f   :  { %1616 = vmatprep.subr.bf16.mxu1 %v1954_v32  ;;  %1579 = vmatprep.subr.bf16.mxu0 %v1968_v11  ;;  %v1201_v32 = vld [vmem:[#allocation7 + $0x90] sm:$0xff] }
 0x132   :  { %1617 = vmatpush1.bf16.msra.mxu1 %v1953_v33  ;;  %1580 = vmatpush1.bf16.msra.mxu0 %v1967_v16  ;;  %v1940_v33 = vcombine.high %v1201_v32, %v1205_v23  ;;  %v1941_v16 = vcombine.low %v1202_v52, %v1206_v29 }
 0x133   :  { %1618 = vmatprep.subr.bf16.mxu1 %v1962_v7  ;;  %1581 = vmatprep.subr.bf16.mxu0 %v1976_v3  ;;  %v1209_v7 = vld [vmem:[#allocation7 + $0xd0] sm:$0xff]  ;;  %v1218_v3 = vld [vmem:[#allocation7 + $0x118] sm:$0xff] }
 0x134   :  { %v1948_v58 = vcombine.high %v1209_v7, %v1213_v34  ;;  %v1947_v18 = vcombine.low %v1209_v7, %v1213_v34  ;;  %v2288_v7 = vmov 1983009808  }
 0x136   :  { %1619 = vmatpush1.bf16.msra.mxu1 %v1961_v51  ;;  %1582 = vmatpush1.bf16.msra.mxu0 %v1975_v0  ;;  %v1221_v0 = vld [vmem:[#allocation7 + $0x130] sm:$0xff] }
 0x137   :  { %1620 = vmatprep.subr.bf16.mxu1 %v1970_v24  ;;  %1649 = vmatprep.subr.bf16.mxu0 %v1924_v59  ;;  %v1939_v24 = vcombine.low %v1201_v32, %v1205_v23  ;;  %v1956_v60 = vcombine.high %v1217_v35, %v1221_v0  ;;  %v1226_v59 = vld [vmem:[#allocation7 + $0x158] sm:$0xff]  ;;  %v1955_v1 = vcombine.low %v1217_v35, %v1221_v0 }
 0x138   :  { %v1966_v15 = vcombine.high %v1226_v59, %v1230_v42 }
 0x13a   :  { %1621 = vmatpush1.bf16.msra.mxu1 %v1969_v28 }
 0x13b   :  { %1622 = vmatprep.subr.bf16.mxu1 %v1978_v4  ;;  %v1225_v4 = vld [vmem:[#allocation7 + $0x150] sm:$0xff] }
 0x13e   :  { %1623 = vmatpush1.bf16.msra.mxu1 %v1977_v10  ;;  %v1958_v10 = vcombine.high %v1218_v3, %v1222_v25 }
 0x13f   :  { %1690 = vmatprep.subr.bf16.mxu1 %v1926_v8 }
 0x1ac   :  { %v2000_v40 = vpop.f32.mrb[0].mxu0 }
 0x1ad   :  { %v2001_v6 = vpop.f32.mrb[1].mxu0 }
 0x1ae   :  { %v2002_v53 = vadd.f32 %v2001_v6, %v2000_v40  ;;  %v2003_v54 = vpop.f32.mrb[2].mxu0  ;;  %v1233_v40 = vld [vmem:[#allocation7 + $0x190] sm:$0xff]  ;;  %v1234_v6 = vld [vmem:[#allocation7 + $0x198] sm:$0xff] }
 0x1af   :  { %v2004_v27 = vpop.f32.mrb[3].mxu0 }
 0x1b0   :  { %v2022_v19 = vpop.f32.mrb[0].mxu1  ;;  %v922_v50 = vadd.f32 %v2002_v53, %v555_v36  ;;  %v1237_v36 = vld [vmem:[#allocation7 + $0x1b0] sm:$0xff]  ;;  %v1238_v53 = vld [vmem:[#allocation7 + $0x1b8] sm:$0xff]  ;;  %v1965_v27 = vcombine.low %v1226_v59, %v1230_v42 }
 0x1b1   :  { %v2023_v21 = vpop.f32.mrb[1].mxu1 }
 0x1b2   :  { %v2024_v17 = vadd.f32 %v2023_v21, %v2022_v19  ;;  %v2025_v20 = vpop.f32.mrb[2].mxu1  ;;  %v439_v19 = vpop.xlane.xlu1 %438  ;;  %v1974_v21 = vcombine.high %v1234_v6, %v1238_v53 }
 0x1b3   :  { %v2026_v63 = vpop.f32.mrb[3].mxu1  ;;  %v1245_v20 = vld [vmem:[#allocation7 + $0x1f0] sm:$0xff] }
 0x1b4   :  { %v962_v61 = vadd.f32 %v2024_v17, %v922_v50  ;;  %v1972_v50 = vcombine.high %v1233_v40, %v1237_v36  ;;  %v1241_v17 = vld [vmem:[#allocation7 + $0x1d0] sm:$0xff]  ;;  %v1242_v63 = vld [vmem:[#allocation7 + $0x1d8] sm:$0xff] }
 0x1b5   :  { %v1979_v2 = vcombine.low %v1241_v17, %v1245_v20 }
 0x1cc   :  { %v2044_v37 = vpop.f32.mrb[4].mxu0 }
 0x1cd   :  { %v2045_v47 = vpop.f32.mrb[5].mxu0 }
 0x1ce   :  { %v2046_v31 = vadd.f32 %v2045_v47, %v2044_v37  ;;  %v2047_v12 = vpop.f32.mrb[6].mxu0  ;;  %v1019_v37 = vmul.f32 %v2693_v38, %v439_v19  ;;  %v1971_v47 = vcombine.low %v1233_v40, %v1237_v36 }
 0x1cf   :  { %v2048_v22 = vpop.f32.mrb[7].mxu0  ;;  %v1980_v12 = vcombine.high %v1241_v17, %v1245_v20 }
 0x1d0   :  { %v1002_v9 = vadd.f32 %v2046_v31, %v962_v61  ;;  %v1246_v61 = vld [vmem:[#allocation7 + $0x1f8] sm:$0xff]  ;;  %v1973_v31 = vcombine.low %v1234_v6, %v1238_v53 }
 0x1d1   :  { %v1982_v30 = vcombine.high %v1242_v63, %v1246_v61  ;;  %v1981_v13 = vcombine.low %v1242_v63, %v1246_v61 }
 0x1d2   :  { %v2696_v44 = vpack.c.bf16 %v1002_v9, %v1002_v9 }
 0x1d4   :  { %1600 = vmatmul.mubr.bf16.vlgmr.msra.gmra.mrb[12].mxu0 %v2696_v44  ;;  %1641 = vmatmul.mubr.bf16.vlgmr.msra.gmra.mrb[12].mxu1 %v2696_v44  ;;  %v2066_v49 = vpop.f32.mrb[4].mxu1 }
 0x1d5   :  { %1650 = vmatpush1.bf16.msra.mxu0 %v1923_v5  ;;  %1691 = vmatpush1.bf16.msra.mxu1 %v1925_v55  ;;  %v2067_v56 = vpop.f32.mrb[5].mxu1  ;;  %v1229_v5 = vld [vmem:[#allocation7 + $0x170] sm:$0xff]  ;;  %v1957_v55 = vcombine.low %v1218_v3, %v1222_v25 }
 0x1d6   :  { %1651 = vmatprep.subr.bf16.mxu0 %v1932_v14  ;;  %1692 = vmatprep.subr.bf16.mxu1 %v1934_v39  ;;  %v2068_v51 = vadd.f32 %v2067_v56, %v2066_v49  ;;  %v2069_v11 = vpop.f32.mrb[6].mxu1  ;;  %v1964_v8 = vcombine.high %v1225_v4, %v1229_v5  ;;  %v1963_v54 = vcombine.low %v1225_v4, %v1229_v5  ;;  %v1733_v49 = vunpack.c.l.s4 %v2288_v7 }
 0x1d7   :  { %1681 = vmatprep.mubr.bf16.mxu0 %v2287_v41  ;;  %1722 = vmatprep.mubr.bf16.mxu1 %v2287_v41  ;;  %v2070_v28 = vpop.f32.mrb[7].mxu1  ;;  %v1949_v41 = vcombine.low %v1210_v46, %v1214_v48  ;;  %v2809_v46 = vld [vmem:[#allocation12_spill] sm:$0xff]  ;;  %v2290_v4 = vmov 1934713408  }
 0x1d8   :  { %v1097_v22 = vadd.f32 %v2068_v51, %v1019_v37  ;;  %v1734_v34 = vunpack.c.0.s8 %v1733_v49  ;;  %v1765_v5 = vunpack.c.l.s4 %v2290_v4 }
 0x1d9   :  { %1652 = vmatpush1.bf16.msra.mxu0 %v1931_v43  ;;  %1693 = vmatpush1.bf16.msra.mxu1 %v1933_v26 }
 0x1da   :  { %1653 = vmatprep.subr.bf16.mxu0 %v1940_v33  ;;  %1694 = vmatprep.subr.bf16.mxu1 %v1942_v57  ;;  %v1983_v57 = vld [vmem:[%s2734_s6] ss:$0 sm:$0xff]  ;;  %v1737_v48 = vsub.s32 %v1734_v34, %v2809_v46  ;;  %s2291_s6 = smov [#allocation8]  }
 0x1db   :  { %1827 = vbcast.lane.b32.xlu1 %v1983_v57, 256  ;;  %s1860_s22 = sshll.u32 %s2291_s6, 4  ;;  %s1861_s22 = int_to_ptr.vmem [resolvable:$true] %s1860_s22 }
 0x1dc   :  { %s2248_s23 = scalar_lea.vmem %s1861_s22, 32  ;;  %p2253_p11 = scmp.lt.s32.totalorder %s1861_s22, %s1861_s22 }
 0x1dd   :  { %1654 = vmatpush1.bf16.msra.mxu0 %v1939_v24  ;;  %1695 = vmatpush1.bf16.msra.mxu1 %v1941_v16  ;;  %p2249_p10 = scmp.ne.s32.totalorder %s1861_s22, %s2248_s23  ;;  %p2254_p12 = scmp.lt.s32.totalorder %s2248_s23, %s2248_s23 }
 0x1de   :  { %1655 = vmatprep.subr.bf16.mxu0 %v1948_v58  ;;  %1696 = vmatprep.subr.bf16.mxu1 %v1950_v45 }
 0x1df   :  { %p2255_p13 = por %p2254_p12, %p2253_p11 }
 0x1e1   :  { %1656 = vmatpush1.bf16.msra.mxu0 %v1947_v18  ;;  %1697 = vmatpush1.bf16.msra.mxu1 %v1949_v41  ;;  %v2289_v18 = vmov 1966171168   ;;  %p2256_p0 = pnand %p2255_p13, %p2249_p10 }
 0x1e2   :  { %1657 = vmatprep.subr.bf16.mxu0 %v1956_v60  ;;  %1698 = vmatprep.subr.bf16.mxu1 %v1958_v10  ;;  %v1783_v41 = vunpack.c.l.s4 %v2289_v18 }
 0x1e4   :  { %v1784_v60 = vunpack.c.0.s8 %v1783_v41 }
 0x1e5   :  { %1658 = vmatpush1.bf16.msra.mxu0 %v1955_v1  ;;  %1699 = vmatpush1.bf16.msra.mxu1 %v1957_v55  ;;  %v1766_v55 = vunpack.c.0.s8 %v1765_v5 }
 0x1e6   :  { %1659 = vmatprep.subr.bf16.mxu0 %v1964_v8  ;;  %1700 = vmatprep.subr.bf16.mxu1 %v1966_v15  ;;  %v1787_v10 = vsub.s32 %v1784_v60, %v2809_v46 }
 0x1e7   :  { %v1769_v17 = vsub.s32 %v1766_v55, %v2809_v46 }
 0x1e9   :  { %1660 = vmatpush1.bf16.msra.mxu0 %v1963_v54  ;;  %1701 = vmatpush1.bf16.msra.mxu1 %v1965_v27 }
 0x1ea   :  { %1661 = vmatprep.subr.bf16.mxu0 %v1972_v50  ;;  %1702 = vmatprep.subr.bf16.mxu1 %v1974_v21 }
 0x1ec   :  { %v2088_v62 = vpop.f32.mrb[8].mxu0 }
 0x1ed   :  { %1662 = vmatpush1.bf16.msra.mxu0 %v1971_v47  ;;  %1703 = vmatpush1.bf16.msra.mxu1 %v1973_v31  ;;  %v2089_v9 = vpop.f32.mrb[9].mxu0 }
 0x1ee   :  { %1663 = vmatprep.subr.bf16.mxu0 %v1980_v12  ;;  %1704 = vmatprep.subr.bf16.mxu1 %v1982_v30  ;;  %v2090_v14 = vadd.f32 %v2089_v9, %v2088_v62  ;;  %v2091_v39 = vpop.f32.mrb[10].mxu0  ;;  %v2810_v12 = vld [vmem:[#allocation13_spill] sm:$0xff] }
 0x1ef   :  { %v2092_v38 = vpop.f32.mrb[11].mxu0 }
 0x1f0   :  { %v1137_v32 = vadd.f32 %v2090_v14, %v1097_v22 }
 0x1f1   :  { %1664 = vmatpush1.bf16.msra.mxu0 %v1979_v2  ;;  %1705 = vmatpush1.bf16.msra.mxu1 %v1981_v13 }
 0x1f4   :  { %1682 = vmatmul.mubr.bf16.vlgmr.msra.gmra.mrb[16].mxu0 %v2696_v44  ;;  %1723 = vmatmul.mubr.bf16.vlgmr.msra.gmra.mrb[16].mxu1 %v2696_v44  ;;  %v2110_v23 = vpop.f32.mrb[8].mxu1 }
 0x1f5   :  { %v2111_v52 = vpop.f32.mrb[9].mxu1 }
 0x1f6   :  { %v2112_v29 = vadd.f32 %v2111_v52, %v2110_v23  ;;  %v2113_v43 = vpop.f32.mrb[10].mxu1  ;;  %v2811_v23 = vlaneseq }
 0x1f7   :  { %v2114_v26 = vpop.f32.mrb[11].mxu1 }
 0x1f8   :  { %v1177_v33 = vadd.f32 %v2112_v29, %v1137_v32  ;;  %v1841_v52 = vand.u32 127, %v2811_v23 }
 0x1fa   :  { %v1788_v59 = vrot.slane %v1177_v33, %v1787_v10  ;;  %v1844_v29 = vsub.s32 %v1841_v52, %v2809_v46 }
 0x1fc   :  { %v1789_v36 = vcombine.high %v1788_v59, %v1788_v59  ;;  %v1796_v63 = vrot.slane %v1788_v59, %v1787_v10 }
 0x1fe   :  { %v1803_v61 = vrot.slane %v1789_v36, %v1787_v10  ;;  %v1807_v30 = vrot.slane %v1796_v63, %v2810_v12 }
 0x200   :  { %v1811_v62 = vrot.slane %v1803_v61, %v2810_v12 }
 0x24d   :  { %v1828_v9 = vpop.permute.xlu1 %1827 }
 0x2a7   :  { %v1601_v56 = vpop.f32.mrb[12].mxu0  ;;  %v1642_v51 = vpop.f32.mrb[12].mxu1 }
 0x2a8   :  { %v1731_v11 = vcombine.low %v1601_v56, %v1642_v51  ;;  %v1603_v44 = vpop.f32.mrb[13].mxu0  ;;  %v1644_v24 = vpop.f32.mrb[13].mxu1 }
 0x2a9   :  { %v1739_v16 = vcombine.low %v1603_v44, %v1644_v24  ;;  %v1605_v28 = vpop.f32.mrb[14].mxu0  ;;  %v1646_v58 = vpop.f32.mrb[14].mxu1 }
 0x2aa   :  { %v1738_v45 = vrot.slane %v1731_v11, %v1737_v48  ;;  %v1606_v35 = vpop.f32.mrb[15].mxu0  ;;  %v1647_v0 = vpop.f32.mrb[15].mxu1 }
 0x2ab   :  { %v1746_v3 = vrot.slane %v1739_v16, %v1737_v48 }
 0x2ad   :  { %v1763_v25 = vcombine.low %v1738_v45, %v1746_v3 }
 0x2af   :  { %v1770_v37 = vrot.slane %v1763_v25, %v1769_v17 }
 0x2c7   :  { %v1683_v42 = vpop.f32.mrb[16].mxu0  ;;  %v1724_v1 = vpop.f32.mrb[16].mxu1 }
 0x2c8   :  { %v1747_v8 = vcombine.low %v1683_v42, %v1724_v1  ;;  %v1685_v15 = vpop.f32.mrb[17].mxu0  ;;  %v1726_v40 = vpop.f32.mrb[17].mxu1 }
 0x2c9   :  { %v1755_v6 = vcombine.low %v1685_v15, %v1726_v40  ;;  %v1687_v53 = vpop.f32.mrb[18].mxu0  ;;  %v1728_v54 = vpop.f32.mrb[18].mxu1 }
 0x2ca   :  { %v1754_v27 = vrot.slane %v1747_v8, %v1737_v48  ;;  %v1688_v19 = vpop.f32.mrb[19].mxu0  ;;  %v1729_v50 = vpop.f32.mrb[19].mxu1 }
 0x2cb   :  { %v1762_v21 = vrot.slane %v1755_v6, %v1737_v48 }
 0x2cd   :  { %v1771_v20 = vcombine.low %v1754_v27, %v1762_v21 }
 0x2cf   :  { %v1778_v47 = vrot.slane %v1771_v20, %v1769_v17 }
 0x2d1   :  { %v1779_v31 = vcombine.low %v1770_v37, %v1778_v47  ;;  %v1780_v22 = vcombine.high %v1770_v37, %v1778_v47 }
 0x2d3   :  { %v1814_v2 = vmul.f32 %v1807_v30, %v1779_v31  ;;  %v1815_v13 = vmul.f32 %v1811_v62, %v1780_v22 }
 0x2d5   :  { %1816 = vadd.xlane.f32.xlu0 %v1814_v2 }
 0x2d9   :  { %1818 = vadd.xlane.f32.xlu0 %v1815_v13 }
 0x362   :  { %v1817_v14 = vpop.xlane.xlu0 %1816 }
 0x363   :  { %v1830_v39 = vadd.f32 %v1828_v9, %v1817_v14 }
 0x365   :  { %1835 = vperm.xlu0 %2132, %v1830_v39  }
 0x366   :  { %v1819_v38 = vpop.xlane.xlu0 %1818 }
 0x367   :  { %v1831_v32 = vadd.f32 %v1828_v9, %v1819_v38 }
 0x369   :  { %1838 = vperm.xlu1 %2133, %v1831_v32  }
 0x3e4   :  { %v1836_v43 = vpop.permute.xlu0 %1835 }
 0x3e5   :  { %v1845_v33 = vrot.slane %v1836_v43, %v1844_v29 }
 0x3e8   :  { %v1839_v26 = vpop.permute.xlu1 %1838 }
 0x3e9   :  { %v1849_v57 = vrot.slane %v1839_v26, %v1844_v29 }
 0x3eb   :  { %v1850_v7 = vsel %vm580_vm1, %v1849_v57, %v1845_v33 }
 0x3ec   :  { %1853 = vst.msk [vmem:[#allocation8] sm:$0x3] %vm1852_vm2, %v1850_v7 }
 0x3ed   :  { %2259 = shalt.err (!%p2256_p0)
}
 0x3ee   :  { %s2260_s25 = scalar_lea.hbm %s2735_s7, 32 }
 0x3ef   :  { %p2261_p1 = scmp.ne.s32.totalorder %s2735_s7, %s2260_s25  ;;  %p2264_p2 = scmp.lt.u32.totalorder %s2260_s25, %s2735_s7 }
 0x3f1   :  { %p2266_p3 = pnand %p2264_p2, %p2261_p1 }
 0x3f3   :  { %2269 = shalt.err (!%p2266_p3)
}
 0x3f4   :  { %1863 = dma.vmem_to_hbm [thread:$0]  %s1861_s22, 32, %s2735_s7, [#allocation4]  }
 0x3f5   :  { %2274 = dma.done.wait [#allocation4], 32  }
 0x3f6   :  { %2275 = vsyncadd [#allocation4], 4294967264 }
 0x3f7   :  { %1867 = vsyncpa [#allocation3], 1 }
 0x3f8   :  { %1868 = vsyncpa [#allocation6], 1 }
 0x3f9   :  { %1869 = vsyncpa [#allocation4], 1 }

</bundles_post_ra>
